<compile_context>
chip_gen: v6e
topology: v6e:2x2x1
jax: 0.10.0
libtpu: 0.0.40
codegen_flags: <defaults>
</compile_context>

<pallas_src>
import functools

import jax
import jax.numpy as jnp
from jax.experimental import pallas as pl
from jax.experimental.pallas import tpu as pltpu

BN_EPS = 1e-5
VMEM_LIMIT = 32 * 1024 * 1024   # > v5e's 16 MiB default, safe on v6e/v7x


# ---------------------------------------------------------------------------
# Kernel factories (everything static: stride, widths, channel counts)
# ---------------------------------------------------------------------------
def _make_conv1_kernel(stride, wo, cout):
    """3x3 conv (pad=1, stride) for one (image, output-row) grid step as 9
    shifted matmuls + per-row BN partial stats from the f32 accumulator."""
    nx = 3 if stride == 1 else 6

    def kernel(*refs):
        x_refs = refs[:nx]
        w_ref = refs[nx]
        y_ref, s_ref, ss_ref = refs[nx + 1:nx + 4]

        acc = jnp.zeros((wo, cout), jnp.float32)
        for dh in range(3):
            if stride == 1:
                row = x_refs[dh][0, 0]                       # (W+2, Cin)
                taps = ((row, 0), (row, 1), (row, 2))
            else:
                row_e = x_refs[dh][0, 0]                     # even padded cols
                row_o = x_refs[3 + dh][0, 0]                 # odd padded cols
                taps = ((row_e, 0), (row_o, 0), (row_e, 1))
            for dw, (row, off) in enumerate(taps):
                acc = acc + jnp.dot(row[off:off + wo, :], w_ref[dh, dw],
                                    preferred_element_type=jnp.float32)

        # Store y1 with one true-zero column on each side so conv2 takes
        # unit-stride width slices (bn1+relu is applied later in conv2, which
        # re-masks these columns after the affine).
        y_ref[0, 0] = jnp.zeros((wo + 2, cout), y_ref.dtype)
        y_ref[0, 0, 1:wo + 1, :] = acc.astype(y_ref.dtype)
        s_ref[0, 0] = jnp.sum(acc, axis=0, keepdims=True)
        ss_ref[0, 0] = jnp.sum(acc * acc, axis=0, keepdims=True)

    return kernel


def _make_conv2_kernel(stride, wo, n_rows, cout):
    """Fused: bn1-affine + ReLU on the loaded y1 halo rows, 3x3 stride-1 conv
    as 9 shifted matmuls, BN2 partial stats, and (stride!=1) the shortcut
    1x1-conv BN partial stats on the same grid step."""
    has_sc = stride != 1

    def kernel(*refs):
        y_in = refs[0:3]
        sc1_ref, sh1_ref, w2_ref = refs[3:6]
        idx = 8 if has_sc else 6
        if has_sc:
            xsc_ref, wsc_ref = refs[6:8]
        y_ref, s_ref, ss_ref = refs[idx:idx + 3]
        if has_sc:
            scs_ref, scss_ref = refs[idx + 3:idx + 5]

        row_id = pl.program_id(1)
        col = jax.lax.broadcasted_iota(jnp.int32, (wo + 2, 1), 0)
        wmask = ((col >= 1) & (col <= wo)).astype(jnp.float32)
        sc1 = sc1_ref[...]
        sh1 = sh1_ref[...]

        acc = jnp.zeros((wo, cout), jnp.float32)
        for dh in range(3):
            z = jnp.maximum(y_in[dh][0, 0].astype(jnp.float32) * sc1 + sh1, 0.0)
            z = z * wmask                                    # zero W-pad cols
            if dh == 0:                                      # top halo is H-pad
                z = z * jnp.where(row_id > 0, 1.0, 0.0)
            elif dh == 2:                                    # bottom halo
                z = z * jnp.where(row_id < n_rows - 1, 1.0, 0.0)
            zb = z.astype(jnp.bfloat16)
            for dw in range(3):
                acc = acc + jnp.dot(zb[dw:dw + wo, :], w2_ref[dh, dw],
                                    preferred_element_type=jnp.float32)

        y_ref[0, 0] = acc.astype(y_ref.dtype)
        s_ref[0, 0] = jnp.sum(acc, axis=0, keepdims=True)
        ss_ref[0, 0] = jnp.sum(acc * acc, axis=0, keepdims=True)

        if has_sc:
            ysc = jnp.dot(xsc_ref[0, 0][0:wo, :], wsc_ref[...],
                          preferred_element_type=jnp.float32)
            scs_ref[0, 0] = jnp.sum(ysc, axis=0, keepdims=True)
            scss_ref[0, 0] = jnp.sum(ysc * ysc, axis=0, keepdims=True)

    return kernel


def _make_final_kernel(stride, wo, cout):
    """bn2 apply + shortcut add (identity, or recomputed 1x1 conv + its BN)
    + LeakyReLU(0.1); lane-exact bf16 store."""
    has_sc = stride != 1

    def kernel(*refs):
        if has_sc:
            (y_ref, xsc_ref, wsc_ref, sc2_ref, sh2_ref,
             scs_ref, shs_ref, o_ref) = refs
        else:
            y_ref, xres_ref, sc2_ref, sh2_ref, o_ref = refs

        out = y_ref[0, 0].astype(jnp.float32) * sc2_ref[...] + sh2_ref[...]
        if has_sc:
            ysc = jnp.dot(xsc_ref[0, 0][0:wo, :], wsc_ref[...],
                          preferred_element_type=jnp.float32)
            out = out + (ysc * scs_ref[...] + shs_ref[...])
        else:
            out = out + xres_ref[0, 0][1:wo + 1, :].astype(jnp.float32)
        out = jnp.where(out >= 0.0, out, 0.1 * out)          # LeakyReLU(0.1)
        o_ref[0, 0] = out.astype(o_ref.dtype)

    return kernel


# ---------------------------------------------------------------------------
# JAX-side glue
# ---------------------------------------------------------------------------
def _bn_affine(s_part, ss_part, m, gamma, beta):
    """Training-mode BN affine from per-tile partial sums (biased variance)."""
    s = jnp.sum(s_part, axis=(0, 1), dtype=jnp.float32)       # (1, C)
    ss = jnp.sum(ss_part, axis=(0, 1), dtype=jnp.float32)
    mean = s / m
    var = jnp.maximum(ss / m - mean * mean, 0.0)               # guard rsqrt
    scale = gamma * jax.lax.rsqrt(var + BN_EPS)
    shift = beta - mean * scale
    return scale, shift


def pack_params(params, stride):
    """Conv weights as (kh, kw, Cin, Cout) bf16, BN params as (1, C) f32.
    No 128-lane padding: every kernel block spans the full channel extent."""
    packed = {
        "w1": jnp.transpose(params["w1"], (2, 3, 1, 0)).astype(jnp.bfloat16),
        "w2": jnp.transpose(params["w2"], (2, 3, 1, 0)).astype(jnp.bfloat16),
        "g1": params["g1"].astype(jnp.float32),
        "b1": params["b1"].astype(jnp.float32),
        "g2": params["g2"].astype(jnp.float32),
        "b2": params["b2"].astype(jnp.float32),
    }
    if stride != 1:
        packed["wsc"] = jnp.transpose(params["wsc"][:, :, 0, 0],
                                      (1, 0)).astype(jnp.bfloat16)
        packed["gsc"] = params["gsc"].astype(jnp.float32)
        packed["bsc"] = params["bsc"].astype(jnp.float32)
    return packed


def basic_block_enc_forward(x_nchw, packed, stride=1):
    assert stride in (1, 2), "BasicBlockEnc uses stride 1 or 2"
    x = jnp.transpose(x_nchw, (0, 2, 3, 1))                    # NCHW -> NHWC
    n, h, w, cin = x.shape
    cout = cin * stride
    ho = (h + 2 - 3) // stride + 1
    wo = (w + 2 - 3) // stride + 1
    wp2 = w + 2

    xpad = jnp.pad(x.astype(jnp.bfloat16), ((0, 0), (1, 1), (1, 1), (0, 0)))

    cparams = pltpu.CompilerParams(
        dimension_semantics=("parallel", "parallel"),
        vmem_limit_bytes=VMEM_LIMIT)

    grid = (n, ho)
    st_shape = jax.ShapeDtypeStruct((n, ho, 1, cout), jnp.float32)
    st_spec = pl.BlockSpec((1, 1, 1, cout), lambda ni, hi: (ni, hi, 0, 0))
    row_out_spec = pl.BlockSpec((1, 1, wo, cout), lambda ni, hi: (ni, hi, 0, 0))
    vec_spec = pl.BlockSpec((1, cout), lambda ni, hi: (0, 0))

    # ------------------ pass 1: conv1 (+ bn1 partial stats) -------------------
    x_even = x_odd = None
    if stride == 1:
        x_in = [xpad, xpad, xpad]
        x_specs = [pl.BlockSpec((1, 1, wp2, cin),
                                lambda ni, hi, d=dh: (ni, hi + d, 0, 0))
                   for dh in range(3)]
    else:
        # W-parity split so stride-2 taps are unit-stride slices in-kernel.
        x_even = xpad[:, :, 0::2, :]
        x_odd = xpad[:, :, 1::2, :]
        we, wod = x_even.shape[2], x_odd.shape[2]
        x_in = [x_even, x_even, x_even, x_odd, x_odd, x_odd]
        x_specs = (
            [pl.BlockSpec((1, 1, we, cin),
                          lambda ni, hi, d=dh: (ni, 2 * hi + d, 0, 0))
             for dh in range(3)]
            + [pl.BlockSpec((1, 1, wod, cin),
                            lambda ni, hi, d=dh: (ni, 2 * hi + d, 0, 0))
               for dh in range(3)])
    w1_spec = pl.BlockSpec((3, 3, cin, cout), lambda ni, hi: (0, 0, 0, 0))

    y1, s1, ss1 = pl.pallas_call(
        _make_conv1_kernel(stride, wo, cout),
        out_shape=(jax.ShapeDtypeStruct((n, ho, wo + 2, cout), jnp.bfloat16),
                   st_shape, st_shape),
        grid=grid,
        in_specs=x_specs + [w1_spec],
        out_specs=(pl.BlockSpec((1, 1, wo + 2, cout),
                                lambda ni, hi: (ni, hi, 0, 0)),
                   st_spec, st_spec),
        compiler_params=cparams,
    )(*x_in, packed["w1"])

    m = n * ho * wo
    scale1, shift1 = _bn_affine(s1, ss1, m, packed["g1"], packed["b1"])

    # ---- pass 2: bn1+relu folded into conv2 (+ bn2 / shortcut partial stats) --
    y1_specs = [
        pl.BlockSpec((1, 1, wo + 2, cout),
                     lambda ni, hi: (ni, jnp.maximum(hi - 1, 0), 0, 0)),
        pl.BlockSpec((1, 1, wo + 2, cout), lambda ni, hi: (ni, hi, 0, 0)),
        pl.BlockSpec((1, 1, wo + 2, cout),
                     lambda ni, hi: (ni, jnp.minimum(hi + 1, ho - 1), 0, 0)),
    ]
    w2_spec = pl.BlockSpec((3, 3, cout, cout), lambda ni, hi: (0, 0, 0, 0))

    conv2_in = [y1, y1, y1, scale1, shift1, packed["w2"]]
    conv2_specs = y1_specs + [vec_spec, vec_spec, w2_spec]
    conv2_shapes = [jax.ShapeDtypeStruct((n, ho, wo, cout), jnp.bfloat16),
                    st_shape, st_shape]
    conv2_out_specs = [row_out_spec, st_spec, st_spec]
    if stride != 1:
        xsc_spec = pl.BlockSpec((1, 1, x_odd.shape[2], cin),
                                lambda ni, hi: (ni, 2 * hi + 1, 0, 0))
        wsc_spec = pl.BlockSpec((cin, cout), lambda ni, hi: (0, 0))
        conv2_in += [x_odd, packed["wsc"]]
        conv2_specs += [xsc_spec, wsc_spec]
        conv2_shapes += [st_shape, st_shape]
        conv2_out_specs += [st_spec, st_spec]

    res2 = pl.pallas_call(
        _make_conv2_kernel(stride, wo, ho, cout),
        out_shape=tuple(conv2_shapes),
        grid=grid,
        in_specs=conv2_specs,
        out_specs=tuple(conv2_out_specs),
        compiler_params=cparams,
    )(*conv2_in)
    if stride == 1:
        y2, s2, ss2 = res2
    else:
        y2, s2, ss2, ssc, scss = res2

    scale2, shift2 = _bn_affine(s2, ss2, m, packed["g2"], packed["b2"])

    # -------- pass 3: bn2 apply + shortcut add + LeakyReLU, bf16 output -------
    if stride == 1:
        fin_in = [y2, xpad, scale2, shift2]
        fin_specs = [row_out_spec,
                     pl.BlockSpec((1, 1, wp2, cin),
                                  lambda ni, hi: (ni, hi + 1, 0, 0)),
                     vec_spec, vec_spec]
    else:
        scalesc, shiftsc = _bn_affine(ssc, scss, m,
                                      packed["gsc"], packed["bsc"])
        fin_in = [y2, x_odd, packed["wsc"], scale2, shift2, scalesc, shiftsc]
        fin_specs = [row_out_spec, xsc_spec, wsc_spec,
                     vec_spec, vec_spec, vec_spec, vec_spec]

    out = pl.pallas_call(
        _make_final_kernel(stride, wo, cout),
        out_shape=jax.ShapeDtypeStruct((n, ho, wo, cout), jnp.bfloat16),
        grid=grid,
        in_specs=fin_specs,
        out_specs=row_out_spec,
        compiler_params=cparams,
    )(*fin_in)

    # TODO(synk): keep NHWC/bf16 when stacking encoder blocks to skip this
    # layout transpose; NCHW kept here to match the module's interface.
    return jnp.transpose(out, (0, 3, 1, 2))


# ---------------------------------------------------------------------------
# Parameters (deterministic, shapes from the module's __init__)
# ---------------------------------------------------------------------------
def init_params(key, in_planes, stride):
    planes = in_planes * stride
    ks = jax.random.split(key, 8)
    p = {
        "w1": jax.random.normal(ks[0], (planes, in_planes, 3, 3), jnp.float32) * 0.1,
        "g1": 1.0 + 0.1 * jax.random.normal(ks[1], (1, planes), jnp.float32),
        "b1": 0.1 * jax.random.normal(ks[2], (1, planes), jnp.float32),
        "w2": jax.random.normal(ks[3], (planes, planes, 3, 3), jnp.float32) * 0.1,
        "g2": 1.0 + 0.1 * jax.random.normal(ks[4], (1, planes), jnp.float32),
        "b2": 0.1 * jax.random.normal(ks[5], (1, planes), jnp.float32),
    }
    if stride != 1:
        p["wsc"] = jax.random.normal(ks[6], (planes, in_planes, 1, 1), jnp.float32) * 0.1
        p["gsc"] = jnp.ones((1, planes), jnp.float32)
        p["bsc"] = jnp.zeros((1, planes), jnp.float32)
    return p


# ---------------------------------------------------------------------------
# Pure-JAX f32 reference (lax.conv) for correctness checking
# ---------------------------------------------------------------------------
def reference_forward(x_nchw, params, stride=1):
    x = jnp.transpose(x_nchw, (0, 2, 3, 1)).astype(jnp.float32)

    def conv(z, w_oihw, s, pad):
        w_hwio = jnp.transpose(w_oihw, (2, 3, 1, 0))
        return jax.lax.conv_general_dilated(
            z, w_hwio, (s, s), ((pad, pad), (pad, pad)),
            dimension_numbers=("NHWC", "HWIO", "NHWC"))

    def bn(y, g, b):
        mean = jnp.mean(y, axis=(0, 1, 2), keepdims=True)
        var = jnp.mean(jnp.square(y - mean), axis=(0, 1, 2), keepdims=True)
        return (y - mean) * jax.lax.rsqrt(var + BN_EPS) * g.reshape(1, 1, 1, -1) \
            + b.reshape(1, 1, 1, -1)

    out = jax.nn.relu(bn(conv(x, params["w1"], stride, 1), params["g1"], params["b1"]))
    out = bn(conv(out, params["w2"], 1, 1), params["g2"], params["b2"])
    if stride == 1:
        sc = x
    else:
        sc = bn(conv(x, params["wsc"], stride, 0), params["gsc"], params["bsc"])
    out = out + sc
    out = jnp.where(out >= 0.0, out, 0.1 * out)
    return jnp.transpose(out, (0, 3, 1, 2))


if __name__ == "__main__":
    key = jax.random.PRNGKey(0)
    kx, kp1, kp2 = jax.random.split(key, 3)
    N, CIN, H, W = 2, 4, 16, 16
    x = jax.random.normal(kx, (N, CIN, H, W), jnp.float32)

    # stride=1 (identity shortcut) and stride=2 (conv1x1 + BN shortcut)
    for stride, kp in ((1, kp1), (2, kp2)):
        params = init_params(kp, CIN, stride)
        packed = pack_params(params, stride)          # prepacked once, outside jit
        fwd = jax.jit(functools.partial(basic_block_enc_forward, stride=stride))
        out = jax.block_until_ready(fwd(x, packed))
        ref = reference_forward(x, params, stride=stride)
        assert out.shape == ref.shape, (out.shape, ref.shape)
        out_f32 = out.astype(jnp.float32)
        # bf16 activations / MXU operands and bf16 final store -> tolerance sized
        # for bf16 rounding through two convs + training-mode BN.
        assert bool(jnp.allclose(out_f32, ref, atol=5e-2, rtol=5e-2)), (
            "max abs diff", float(jnp.max(jnp.abs(out_f32 - ref))))

    print("KERNEL_OK")
</pallas_src>

<mosaic_0001>
module attributes {stable_mosaic.version = 11 : i64} {
  func.func @kernel(%arg0: i32, %arg1: i32, %arg2: memref<1x1x18x4xbf16, #tpu.memory_space<vmem>>, %arg3: memref<1x1x18x4xbf16, #tpu.memory_space<vmem>>, %arg4: memref<1x1x18x4xbf16, #tpu.memory_space<vmem>>, %arg5: memref<3x3x4x4xbf16, #tpu.memory_space<vmem>>, %arg6: memref<1x1x18x4xbf16, #tpu.memory_space<vmem>>, %arg7: memref<1x1x1x4xf32, #tpu.memory_space<vmem>>, %arg8: memref<1x1x1x4xf32, #tpu.memory_space<vmem>>) attributes {dimension_semantics = [#tpu.dimension_semantics<parallel>, #tpu.dimension_semantics<parallel>], iteration_bounds = array<i64: 2, 16>, scalar_prefetch = 0 : i64, scratch_operands = 0 : i64, tpu.core_type = #tpu.core_type<tc>, window_params = [{transform_indices = @transform_0, window_bounds = array<i64: 1, 1, 18, 4>}, {transform_indices = @transform_1, window_bounds = array<i64: 1, 1, 18, 4>}, {transform_indices = @transform_2, window_bounds = array<i64: 1, 1, 18, 4>}, {pipeline_mode = #tpu.pipeline_mode<synchronous>, transform_indices = @transform_3, window_bounds = array<i64: 3, 3, 4, 4>}, {transform_indices = @transform_4, window_bounds = array<i64: 1, 1, 18, 4>}, {transform_indices = @transform_5, window_bounds = array<i64: 1, 1, 1, 4>}, {transform_indices = @transform_6, window_bounds = array<i64: 1, 1, 1, 4>}]} {
    %cst = arith.constant 0.000000e+00 : f32
    %0 = vector.broadcast %cst : f32 to vector<16x4xf32>
    %c0 = arith.constant 0 : index
    %c0_0 = arith.constant 0 : index
    %c0_1 = arith.constant 0 : index
    %c0_2 = arith.constant 0 : index
    %1 = vector.load %arg2[%c0, %c0_0, %c0_1, %c0_2] : memref<1x1x18x4xbf16, #tpu.memory_space<vmem>>, vector<1x1x18x4xbf16>
    %2 = vector.shape_cast %1 : vector<1x1x18x4xbf16> to vector<18x4xbf16>
    %3 = vector.extract_strided_slice %2 {offsets = [0, 0], sizes = [16, 4], strides = [1, 1]} : vector<18x4xbf16> to vector<16x4xbf16>
    %c0_3 = arith.constant 0 : index
    %c0_4 = arith.constant 0 : index
    %c0_5 = arith.constant 0 : index
    %c0_6 = arith.constant 0 : index
    %4 = vector.load %arg5[%c0_3, %c0_4, %c0_5, %c0_6] : memref<3x3x4x4xbf16, #tpu.memory_space<vmem>>, vector<1x1x4x4xbf16>
    %5 = vector.shape_cast %4 : vector<1x1x4x4xbf16> to vector<4x4xbf16>
    %cst_7 = arith.constant dense<0.000000e+00> : vector<16x4xf32>
    %6 = tpu.matmul %3, %5, %cst_7 {dimension_numbers = #tpu.dot_dimension_numbers<[1], [0], [0], [1], [0, 0, 1, 1], [], []>} : vector<16x4xbf16>, vector<4x4xbf16>, vector<16x4xf32> -> vector<16x4xf32>
    %7 = arith.addf %0, %6 : vector<16x4xf32>
    %8 = vector.extract_strided_slice %2 {offsets = [1, 0], sizes = [16, 4], strides = [1, 1]} : vector<18x4xbf16> to vector<16x4xbf16>
    %c0_8 = arith.constant 0 : index
    %c1 = arith.constant 1 : index
    %c0_9 = arith.constant 0 : index
    %c0_10 = arith.constant 0 : index
    %9 = vector.load %arg5[%c0_8, %c1, %c0_9, %c0_10] : memref<3x3x4x4xbf16, #tpu.memory_space<vmem>>, vector<1x1x4x4xbf16>
    %10 = vector.shape_cast %9 : vector<1x1x4x4xbf16> to vector<4x4xbf16>
    %cst_11 = arith.constant dense<0.000000e+00> : vector<16x4xf32>
    %11 = tpu.matmul %8, %10, %cst_11 {dimension_numbers = #tpu.dot_dimension_numbers<[1], [0], [0], [1], [0, 0, 1, 1], [], []>} : vector<16x4xbf16>, vector<4x4xbf16>, vector<16x4xf32> -> vector<16x4xf32>
    %12 = arith.addf %7, %11 : vector<16x4xf32>
    %13 = vector.extract_strided_slice %2 {offsets = [2, 0], sizes = [16, 4], strides = [1, 1]} : vector<18x4xbf16> to vector<16x4xbf16>
    %c0_12 = arith.constant 0 : index
    %c2 = arith.constant 2 : index
    %c0_13 = arith.constant 0 : index
    %c0_14 = arith.constant 0 : index
    %14 = vector.load %arg5[%c0_12, %c2, %c0_13, %c0_14] : memref<3x3x4x4xbf16, #tpu.memory_space<vmem>>, vector<1x1x4x4xbf16>
    %15 = vector.shape_cast %14 : vector<1x1x4x4xbf16> to vector<4x4xbf16>
    %cst_15 = arith.constant dense<0.000000e+00> : vector<16x4xf32>
    %16 = tpu.matmul %13, %15, %cst_15 {dimension_numbers = #tpu.dot_dimension_numbers<[1], [0], [0], [1], [0, 0, 1, 1], [], []>} : vector<16x4xbf16>, vector<4x4xbf16>, vector<16x4xf32> -> vector<16x4xf32>
    %17 = arith.addf %12, %16 : vector<16x4xf32>
    %c0_16 = arith.constant 0 : index
    %c0_17 = arith.constant 0 : index
    %c0_18 = arith.constant 0 : index
    %c0_19 = arith.constant 0 : index
    %18 = vector.load %arg3[%c0_16, %c0_17, %c0_18, %c0_19] : memref<1x1x18x4xbf16, #tpu.memory_space<vmem>>, vector<1x1x18x4xbf16>
    %19 = vector.shape_cast %18 : vector<1x1x18x4xbf16> to vector<18x4xbf16>
    %20 = vector.extract_strided_slice %19 {offsets = [0, 0], sizes = [16, 4], strides = [1, 1]} : vector<18x4xbf16> to vector<16x4xbf16>
    %c1_20 = arith.constant 1 : index
    %c0_21 = arith.constant 0 : index
    %c0_22 = arith.constant 0 : index
    %c0_23 = arith.constant 0 : index
    %21 = vector.load %arg5[%c1_20, %c0_21, %c0_22, %c0_23] : memref<3x3x4x4xbf16, #tpu.memory_space<vmem>>, vector<1x1x4x4xbf16>
    %22 = vector.shape_cast %21 : vector<1x1x4x4xbf16> to vector<4x4xbf16>
    %cst_24 = arith.constant dense<0.000000e+00> : vector<16x4xf32>
    %23 = tpu.matmul %20, %22, %cst_24 {dimension_numbers = #tpu.dot_dimension_numbers<[1], [0], [0], [1], [0, 0, 1, 1], [], []>} : vector<16x4xbf16>, vector<4x4xbf16>, vector<16x4xf32> -> vector<16x4xf32>
    %24 = arith.addf %17, %23 : vector<16x4xf32>
    %25 = vector.extract_strided_slice %19 {offsets = [1, 0], sizes = [16, 4], strides = [1, 1]} : vector<18x4xbf16> to vector<16x4xbf16>
    %c1_25 = arith.constant 1 : index
    %c1_26 = arith.constant 1 : index
    %c0_27 = arith.constant 0 : index
    %c0_28 = arith.constant 0 : index
    %26 = vector.load %arg5[%c1_25, %c1_26, %c0_27, %c0_28] : memref<3x3x4x4xbf16, #tpu.memory_space<vmem>>, vector<1x1x4x4xbf16>
    %27 = vector.shape_cast %26 : vector<1x1x4x4xbf16> to vector<4x4xbf16>
    %cst_29 = arith.constant dense<0.000000e+00> : vector<16x4xf32>
    %28 = tpu.matmul %25, %27, %cst_29 {dimension_numbers = #tpu.dot_dimension_numbers<[1], [0], [0], [1], [0, 0, 1, 1], [], []>} : vector<16x4xbf16>, vector<4x4xbf16>, vector<16x4xf32> -> vector<16x4xf32>
    %29 = arith.addf %24, %28 : vector<16x4xf32>
    %30 = vector.extract_strided_slice %19 {offsets = [2, 0], sizes = [16, 4], strides = [1, 1]} : vector<18x4xbf16> to vector<16x4xbf16>
    %c1_30 = arith.constant 1 : index
    %c2_31 = arith.constant 2 : index
    %c0_32 = arith.constant 0 : index
    %c0_33 = arith.constant 0 : index
    %31 = vector.load %arg5[%c1_30, %c2_31, %c0_32, %c0_33] : memref<3x3x4x4xbf16, #tpu.memory_space<vmem>>, vector<1x1x4x4xbf16>
    %32 = vector.shape_cast %31 : vector<1x1x4x4xbf16> to vector<4x4xbf16>
    %cst_34 = arith.constant dense<0.000000e+00> : vector<16x4xf32>
    %33 = tpu.matmul %30, %32, %cst_34 {dimension_numbers = #tpu.dot_dimension_numbers<[1], [0], [0], [1], [0, 0, 1, 1], [], []>} : vector<16x4xbf16>, vector<4x4xbf16>, vector<16x4xf32> -> vector<16x4xf32>
    %34 = arith.addf %29, %33 : vector<16x4xf32>
    %c0_35 = arith.constant 0 : index
    %c0_36 = arith.constant 0 : index
    %c0_37 = arith.constant 0 : index
    %c0_38 = arith.constant 0 : index
    %35 = vector.load %arg4[%c0_35, %c0_36, %c0_37, %c0_38] : memref<1x1x18x4xbf16, #tpu.memory_space<vmem>>, vector<1x1x18x4xbf16>
    %36 = vector.shape_cast %35 : vector<1x1x18x4xbf16> to vector<18x4xbf16>
    %37 = vector.extract_strided_slice %36 {offsets = [0, 0], sizes = [16, 4], strides = [1, 1]} : vector<18x4xbf16> to vector<16x4xbf16>
    %c2_39 = arith.constant 2 : index
    %c0_40 = arith.constant 0 : index
    %c0_41 = arith.constant 0 : index
    %c0_42 = arith.constant 0 : index
    %38 = vector.load %arg5[%c2_39, %c0_40, %c0_41, %c0_42] : memref<3x3x4x4xbf16, #tpu.memory_space<vmem>>, vector<1x1x4x4xbf16>
    %39 = vector.shape_cast %38 : vector<1x1x4x4xbf16> to vector<4x4xbf16>
    %cst_43 = arith.constant dense<0.000000e+00> : vector<16x4xf32>
    %40 = tpu.matmul %37, %39, %cst_43 {dimension_numbers = #tpu.dot_dimension_numbers<[1], [0], [0], [1], [0, 0, 1, 1], [], []>} : vector<16x4xbf16>, vector<4x4xbf16>, vector<16x4xf32> -> vector<16x4xf32>
    %41 = arith.addf %34, %40 : vector<16x4xf32>
    %42 = vector.extract_strided_slice %36 {offsets = [1, 0], sizes = [16, 4], strides = [1, 1]} : vector<18x4xbf16> to vector<16x4xbf16>
    %c2_44 = arith.constant 2 : index
    %c1_45 = arith.constant 1 : index
    %c0_46 = arith.constant 0 : index
    %c0_47 = arith.constant 0 : index
    %43 = vector.load %arg5[%c2_44, %c1_45, %c0_46, %c0_47] : memref<3x3x4x4xbf16, #tpu.memory_space<vmem>>, vector<1x1x4x4xbf16>
    %44 = vector.shape_cast %43 : vector<1x1x4x4xbf16> to vector<4x4xbf16>
    %cst_48 = arith.constant dense<0.000000e+00> : vector<16x4xf32>
    %45 = tpu.matmul %42, %44, %cst_48 {dimension_numbers = #tpu.dot_dimension_numbers<[1], [0], [0], [1], [0, 0, 1, 1], [], []>} : vector<16x4xbf16>, vector<4x4xbf16>, vector<16x4xf32> -> vector<16x4xf32>
    %46 = arith.addf %41, %45 : vector<16x4xf32>
    %47 = vector.extract_strided_slice %36 {offsets = [2, 0], sizes = [16, 4], strides = [1, 1]} : vector<18x4xbf16> to vector<16x4xbf16>
    %c2_49 = arith.constant 2 : index
    %c2_50 = arith.constant 2 : index
    %c0_51 = arith.constant 0 : index
    %c0_52 = arith.constant 0 : index
    %48 = vector.load %arg5[%c2_49, %c2_50, %c0_51, %c0_52] : memref<3x3x4x4xbf16, #tpu.memory_space<vmem>>, vector<1x1x4x4xbf16>
    %49 = vector.shape_cast %48 : vector<1x1x4x4xbf16> to vector<4x4xbf16>
    %cst_53 = arith.constant dense<0.000000e+00> : vector<16x4xf32>
    %50 = tpu.matmul %47, %49, %cst_53 {dimension_numbers = #tpu.dot_dimension_numbers<[1], [0], [0], [1], [0, 0, 1, 1], [], []>} : vector<16x4xbf16>, vector<4x4xbf16>, vector<16x4xf32> -> vector<16x4xf32>
    %51 = arith.addf %46, %50 : vector<16x4xf32>
    %cst_54 = arith.constant 0.000000e+00 : bf16
    %52 = vector.broadcast %cst_54 : bf16 to vector<18x4xbf16>
    %c0_55 = arith.constant 0 : index
    %c0_56 = arith.constant 0 : index
    %c0_57 = arith.constant 0 : index
    %c0_58 = arith.constant 0 : index
    %53 = vector.load %arg6[%c0_55, %c0_56, %c0_57, %c0_58] : memref<1x1x18x4xbf16, #tpu.memory_space<vmem>>, vector<1x1x18x4xbf16>
    %54 = vector.shape_cast %53 : vector<1x1x18x4xbf16> to vector<18x4xbf16>
    %55 = vector.shape_cast %52 : vector<18x4xbf16> to vector<1x1x18x4xbf16>
    tpu.vector_store %arg6[%c0_55, %c0_56, %c0_57, %c0_58], %55 {strides = array<i32>} : memref<1x1x18x4xbf16, #tpu.memory_space<vmem>>, vector<1x1x18x4xbf16>,
    %56 = arith.truncf %51 : vector<16x4xf32> to vector<16x4xbf16>
    %c0_59 = arith.constant 0 : index
    %c0_60 = arith.constant 0 : index
    %c1_61 = arith.constant 1 : index
    %c0_62 = arith.constant 0 : index
    %57 = vector.load %arg6[%c0_59, %c0_60, %c1_61, %c0_62] : memref<1x1x18x4xbf16, #tpu.memory_space<vmem>>, vector<1x1x16x4xbf16>
    %58 = vector.shape_cast %57 : vector<1x1x16x4xbf16> to vector<16x4xbf16>
    %59 = vector.shape_cast %56 : vector<16x4xbf16> to vector<1x1x16x4xbf16>
    tpu.vector_store %arg6[%c0_59, %c0_60, %c1_61, %c0_62], %59 {strides = array<i32>} : memref<1x1x18x4xbf16, #tpu.memory_space<vmem>>, vector<1x1x16x4xbf16>,
    %cst_63 = arith.constant dense<0.000000e+00> : vector<4xf32>
    %60 = vector.multi_reduction <add>, %51, %cst_63 [0] : vector<16x4xf32> to vector<4xf32>
    %61 = vector.shape_cast %60 : vector<4xf32> to vector<1x4xf32>
    %c0_64 = arith.constant 0 : index
    %c0_65 = arith.constant 0 : index
    %c0_66 = arith.constant 0 : index
    %c0_67 = arith.constant 0 : index
    %62 = vector.load %arg7[%c0_64, %c0_65, %c0_66, %c0_67] : memref<1x1x1x4xf32, #tpu.memory_space<vmem>>, vector<1x1x1x4xf32>
    %63 = vector.shape_cast %62 : vector<1x1x1x4xf32> to vector<1x4xf32>
    %64 = vector.shape_cast %61 : vector<1x4xf32> to vector<1x1x1x4xf32>
    tpu.vector_store %arg7[%c0_64, %c0_65, %c0_66, %c0_67], %64 {strides = array<i32>} : memref<1x1x1x4xf32, #tpu.memory_space<vmem>>, vector<1x1x1x4xf32>,
    %65 = arith.mulf %51, %51 : vector<16x4xf32>
    %cst_68 = arith.constant dense<0.000000e+00> : vector<4xf32>
    %66 = vector.multi_reduction <add>, %65, %cst_68 [0] : vector<16x4xf32> to vector<4xf32>
    %67 = vector.shape_cast %66 : vector<4xf32> to vector<1x4xf32>
    %c0_69 = arith.constant 0 : index
    %c0_70 = arith.constant 0 : index
    %c0_71 = arith.constant 0 : index
    %c0_72 = arith.constant 0 : index
    %68 = vector.load %arg8[%c0_69, %c0_70, %c0_71, %c0_72] : memref<1x1x1x4xf32, #tpu.memory_space<vmem>>, vector<1x1x1x4xf32>
    %69 = vector.shape_cast %68 : vector<1x1x1x4xf32> to vector<1x4xf32>
    %70 = vector.shape_cast %67 : vector<1x4xf32> to vector<1x1x1x4xf32>
    tpu.vector_store %arg8[%c0_69, %c0_70, %c0_71, %c0_72], %70 {strides = array<i32>} : memref<1x1x1x4xf32, #tpu.memory_space<vmem>>, vector<1x1x1x4xf32>,
    return
  }
  func.func @transform_0(%arg0: i32, %arg1: i32) -> (i32, i32, i32, i32) {
    %c0_i32 = arith.constant 0 : i32
    %0 = arith.addi %arg1, %c0_i32 : i32
    %c0_i32_0 = arith.constant 0 : i32
    %c0_i32_1 = arith.constant 0 : i32
    %c0_i32_2 = arith.constant 0 : i32
    return %arg0, %0, %c0_i32_0, %c0_i32_1 : i32, i32, i32, i32
  }
  func.func @transform_1(%arg0: i32, %arg1: i32) -> (i32, i32, i32, i32) {
    %c1_i32 = arith.constant 1 : i32
    %0 = arith.addi %arg1, %c1_i32 : i32
    %c0_i32 = arith.constant 0 : i32
    %c0_i32_0 = arith.constant 0 : i32
    %c0_i32_1 = arith.constant 0 : i32
    return %arg0, %0, %c0_i32, %c0_i32_0 : i32, i32, i32, i32
  }
  func.func @transform_2(%arg0: i32, %arg1: i32) -> (i32, i32, i32, i32) {
    %c2_i32 = arith.constant 2 : i32
    %0 = arith.addi %arg1, %c2_i32 : i32
    %c0_i32 = arith.constant 0 : i32
    %c0_i32_0 = arith.constant 0 : i32
    %c0_i32_1 = arith.constant 0 : i32
    return %arg0, %0, %c0_i32, %c0_i32_0 : i32, i32, i32, i32
  }
  func.func @transform_3(%arg0: i32, %arg1: i32) -> (i32, i32, i32, i32) {
    %c0_i32 = arith.constant 0 : i32
    %c0_i32_0 = arith.constant 0 : i32
    %c0_i32_1 = arith.constant 0 : i32
    %c0_i32_2 = arith.constant 0 : i32
    %c0_i32_3 = arith.constant 0 : i32
    return %c0_i32, %c0_i32_0, %c0_i32_1, %c0_i32_2 : i32, i32, i32, i32
  }
  func.func @transform_4(%arg0: i32, %arg1: i32) -> (i32, i32, i32, i32) {
    %c0_i32 = arith.constant 0 : i32
    %c0_i32_0 = arith.constant 0 : i32
    %c0_i32_1 = arith.constant 0 : i32
    return %arg0, %arg1, %c0_i32, %c0_i32_0 : i32, i32, i32, i32
  }
  func.func @transform_5(%arg0: i32, %arg1: i32) -> (i32, i32, i32, i32) {
    %c0_i32 = arith.constant 0 : i32
    %c0_i32_0 = arith.constant 0 : i32
    %c0_i32_1 = arith.constant 0 : i32
    return %arg0, %arg1, %c0_i32, %c0_i32_0 : i32, i32, i32, i32
  }
  func.func @transform_6(%arg0: i32, %arg1: i32) -> (i32, i32, i32, i32) {
    %c0_i32 = arith.constant 0 : i32
    %c0_i32_0 = arith.constant 0 : i32
    %c0_i32_1 = arith.constant 0 : i32
    return %arg0, %arg1, %c0_i32, %c0_i32_0 : i32, i32, i32, i32
  }
}

module attributes {stable_mosaic.version = 11 : i64} {
  func.func @kernel(%arg0: i32, %arg1: i32, %arg2: memref<1x1x18x4xbf16, #tpu.memory_space<vmem>>, %arg3: memref<1x1x18x4xbf16, #tpu.memory_space<vmem>>, %arg4: memref<1x1x18x4xbf16, #tpu.memory_space<vmem>>, %arg5: memref<1x4xf32, #tpu.memory_space<vmem>>, %arg6: memref<1x4xf32, #tpu.memory_space<vmem>>, %arg7: memref<3x3x4x4xbf16, #tpu.memory_space<vmem>>, %arg8: memref<1x1x16x4xbf16, #tpu.memory_space<vmem>>, %arg9: memref<1x1x1x4xf32, #tpu.memory_space<vmem>>, %arg10: memref<1x1x1x4xf32, #tpu.memory_space<vmem>>) attributes {dimension_semantics = [#tpu.dimension_semantics<parallel>, #tpu.dimension_semantics<parallel>], iteration_bounds = array<i64: 2, 16>, scalar_prefetch = 0 : i64, scratch_operands = 0 : i64, tpu.core_type = #tpu.core_type<tc>, window_params = [{transform_indices = @transform_0, window_bounds = array<i64: 1, 1, 18, 4>}, {transform_indices = @transform_1, window_bounds = array<i64: 1, 1, 18, 4>}, {transform_indices = @transform_2, window_bounds = array<i64: 1, 1, 18, 4>}, {pipeline_mode = #tpu.pipeline_mode<synchronous>, transform_indices = @transform_3, window_bounds = array<i64: 1, 4>}, {pipeline_mode = #tpu.pipeline_mode<synchronous>, transform_indices = @transform_4, window_bounds = array<i64: 1, 4>}, {pipeline_mode = #tpu.pipeline_mode<synchronous>, transform_indices = @transform_5, window_bounds = array<i64: 3, 3, 4, 4>}, {transform_indices = @transform_6, window_bounds = array<i64: 1, 1, 16, 4>}, {transform_indices = @transform_7, window_bounds = array<i64: 1, 1, 1, 4>}, {transform_indices = @transform_8, window_bounds = array<i64: 1, 1, 1, 4>}]} {
    %0 = tpu.iota {dimensions = array<i32: 0>} : vector<18x1xi32>
    %c1_i32 = arith.constant 1 : i32
    %1 = vector.broadcast %c1_i32 : i32 to vector<18x1xi32>
    %2 = arith.cmpi sge, %0, %1 : vector<18x1xi32>
    %c16_i32 = arith.constant 16 : i32
    %3 = vector.broadcast %c16_i32 : i32 to vector<18x1xi32>
    %4 = arith.cmpi sle, %0, %3 : vector<18x1xi32>
    %5 = arith.andi %2, %4 : vector<18x1xi1>
    %6 = arith.extui %5 : vector<18x1xi1> to vector<18x1xi32>
    %7 = arith.sitofp %6 : vector<18x1xi32> to vector<18x1xf32>
    %c0 = arith.constant 0 : index
    %c0_0 = arith.constant 0 : index
    %8 = vector.load %arg5[%c0, %c0_0] : memref<1x4xf32, #tpu.memory_space<vmem>>, vector<1x4xf32>
    %c0_1 = arith.constant 0 : index
    %c0_2 = arith.constant 0 : index
    %9 = vector.load %arg6[%c0_1, %c0_2] : memref<1x4xf32, #tpu.memory_space<vmem>>, vector<1x4xf32>
    %cst = arith.constant 0.000000e+00 : f32
    %10 = vector.broadcast %cst : f32 to vector<16x4xf32>
    %c0_3 = arith.constant 0 : index
    %c0_4 = arith.constant 0 : index
    %c0_5 = arith.constant 0 : index
    %c0_6 = arith.constant 0 : index
    %11 = vector.load %arg2[%c0_3, %c0_4, %c0_5, %c0_6] : memref<1x1x18x4xbf16, #tpu.memory_space<vmem>>, vector<1x1x18x4xbf16>
    %12 = vector.shape_cast %11 : vector<1x1x18x4xbf16> to vector<18x4xbf16>
    %13 = arith.extf %12 : vector<18x4xbf16> to vector<18x4xf32>
    %14 = vector.broadcast %8 : vector<1x4xf32> to vector<18x4xf32>
    %15 = arith.mulf %13, %14 : vector<18x4xf32>
    %16 = vector.broadcast %9 : vector<1x4xf32> to vector<18x4xf32>
    %17 = arith.addf %15, %16 : vector<18x4xf32>
    %cst_7 = arith.constant 0.000000e+00 : f32
    %18 = vector.broadcast %cst_7 : f32 to vector<18x4xf32>
    %19 = arith.maximumf %17, %18 : vector<18x4xf32>
    %20 = vector.broadcast %7 : vector<18x1xf32> to vector<18x4xf32>
    %21 = arith.mulf %19, %20 : vector<18x4xf32>
    %c0_i32 = arith.constant 0 : i32
    %22 = arith.cmpi sgt, %arg1, %c0_i32 : i32
    %cst_8 = arith.constant 1.000000e+00 : f32
    %cst_9 = arith.constant 0.000000e+00 : f32
    %23 = arith.select %22, %cst_8, %cst_9 : f32
    %24 = vector.broadcast %23 : f32 to vector<18x4xf32>
    %25 = arith.mulf %21, %24 : vector<18x4xf32>
    %26 = arith.truncf %25 : vector<18x4xf32> to vector<18x4xbf16>
    %27 = vector.extract_strided_slice %26 {offsets = [0, 0], sizes = [16, 4], strides = [1, 1]} : vector<18x4xbf16> to vector<16x4xbf16>
    %c0_10 = arith.constant 0 : index
    %c0_11 = arith.constant 0 : index
    %c0_12 = arith.constant 0 : index
    %c0_13 = arith.constant 0 : index
    %28 = vector.load %arg7[%c0_10, %c0_11, %c0_12, %c0_13] : memref<3x3x4x4xbf16, #tpu.memory_space<vmem>>, vector<1x1x4x4xbf16>
    %29 = vector.shape_cast %28 : vector<1x1x4x4xbf16> to vector<4x4xbf16>
    %cst_14 = arith.constant dense<0.000000e+00> : vector<16x4xf32>
    %30 = tpu.matmul %27, %29, %cst_14 {dimension_numbers = #tpu.dot_dimension_numbers<[1], [0], [0], [1], [0, 0, 1, 1], [], []>} : vector<16x4xbf16>, vector<4x4xbf16>, vector<16x4xf32> -> vector<16x4xf32>
    %31 = arith.addf %10, %30 : vector<16x4xf32>
    %32 = vector.extract_strided_slice %26 {offsets = [1, 0], sizes = [16, 4], strides = [1, 1]} : vector<18x4xbf16> to vector<16x4xbf16>
    %c0_15 = arith.constant 0 : index
    %c1 = arith.constant 1 : index
    %c0_16 = arith.constant 0 : index
    %c0_17 = arith.constant 0 : index
    %33 = vector.load %arg7[%c0_15, %c1, %c0_16, %c0_17] : memref<3x3x4x4xbf16, #tpu.memory_space<vmem>>, vector<1x1x4x4xbf16>
    %34 = vector.shape_cast %33 : vector<1x1x4x4xbf16> to vector<4x4xbf16>
    %cst_18 = arith.constant dense<0.000000e+00> : vector<16x4xf32>
    %35 = tpu.matmul %32, %34, %cst_18 {dimension_numbers = #tpu.dot_dimension_numbers<[1], [0], [0], [1], [0, 0, 1, 1], [], []>} : vector<16x4xbf16>, vector<4x4xbf16>, vector<16x4xf32> -> vector<16x4xf32>
    %36 = arith.addf %31, %35 : vector<16x4xf32>
    %37 = vector.extract_strided_slice %26 {offsets = [2, 0], sizes = [16, 4], strides = [1, 1]} : vector<18x4xbf16> to vector<16x4xbf16>
    %c0_19 = arith.constant 0 : index
    %c2 = arith.constant 2 : index
    %c0_20 = arith.constant 0 : index
    %c0_21 = arith.constant 0 : index
    %38 = vector.load %arg7[%c0_19, %c2, %c0_20, %c0_21] : memref<3x3x4x4xbf16, #tpu.memory_space<vmem>>, vector<1x1x4x4xbf16>
    %39 = vector.shape_cast %38 : vector<1x1x4x4xbf16> to vector<4x4xbf16>
    %cst_22 = arith.constant dense<0.000000e+00> : vector<16x4xf32>
    %40 = tpu.matmul %37, %39, %cst_22 {dimension_numbers = #tpu.dot_dimension_numbers<[1], [0], [0], [1], [0, 0, 1, 1], [], []>} : vector<16x4xbf16>, vector<4x4xbf16>, vector<16x4xf32> -> vector<16x4xf32>
    %41 = arith.addf %36, %40 : vector<16x4xf32>
    %c0_23 = arith.constant 0 : index
    %c0_24 = arith.constant 0 : index
    %c0_25 = arith.constant 0 : index
    %c0_26 = arith.constant 0 : index
    %42 = vector.load %arg3[%c0_23, %c0_24, %c0_25, %c0_26] : memref<1x1x18x4xbf16, #tpu.memory_space<vmem>>, vector<1x1x18x4xbf16>
    %43 = vector.shape_cast %42 : vector<1x1x18x4xbf16> to vector<18x4xbf16>
    %44 = arith.extf %43 : vector<18x4xbf16> to vector<18x4xf32>
    %45 = vector.broadcast %8 : vector<1x4xf32> to vector<18x4xf32>
    %46 = arith.mulf %44, %45 : vector<18x4xf32>
    %47 = vector.broadcast %9 : vector<1x4xf32> to vector<18x4xf32>
    %48 = arith.addf %46, %47 : vector<18x4xf32>
    %cst_27 = arith.constant 0.000000e+00 : f32
    %49 = vector.broadcast %cst_27 : f32 to vector<18x4xf32>
    %50 = arith.maximumf %48, %49 : vector<18x4xf32>
    %51 = vector.broadcast %7 : vector<18x1xf32> to vector<18x4xf32>
    %52 = arith.mulf %50, %51 : vector<18x4xf32>
    %53 = arith.truncf %52 : vector<18x4xf32> to vector<18x4xbf16>
    %54 = vector.extract_strided_slice %53 {offsets = [0, 0], sizes = [16, 4], strides = [1, 1]} : vector<18x4xbf16> to vector<16x4xbf16>
    %c1_28 = arith.constant 1 : index
    %c0_29 = arith.constant 0 : index
    %c0_30 = arith.constant 0 : index
    %c0_31 = arith.constant 0 : index
    %55 = vector.load %arg7[%c1_28, %c0_29, %c0_30, %c0_31] : memref<3x3x4x4xbf16, #tpu.memory_space<vmem>>, vector<1x1x4x4xbf16>
    %56 = vector.shape_cast %55 : vector<1x1x4x4xbf16> to vector<4x4xbf16>
    %cst_32 = arith.constant dense<0.000000e+00> : vector<16x4xf32>
    %57 = tpu.matmul %54, %56, %cst_32 {dimension_numbers = #tpu.dot_dimension_numbers<[1], [0], [0], [1], [0, 0, 1, 1], [], []>} : vector<16x4xbf16>, vector<4x4xbf16>, vector<16x4xf32> -> vector<16x4xf32>
    %58 = arith.addf %41, %57 : vector<16x4xf32>
    %59 = vector.extract_strided_slice %53 {offsets = [1, 0], sizes = [16, 4], strides = [1, 1]} : vector<18x4xbf16> to vector<16x4xbf16>
    %c1_33 = arith.constant 1 : index
    %c1_34 = arith.constant 1 : index
    %c0_35 = arith.constant 0 : index
    %c0_36 = arith.constant 0 : index
    %60 = vector.load %arg7[%c1_33, %c1_34, %c0_35, %c0_36] : memref<3x3x4x4xbf16, #tpu.memory_space<vmem>>, vector<1x1x4x4xbf16>
    %61 = vector.shape_cast %60 : vector<1x1x4x4xbf16> to vector<4x4xbf16>
    %cst_37 = arith.constant dense<0.000000e+00> : vector<16x4xf32>
    %62 = tpu.matmul %59, %61, %cst_37 {dimension_numbers = #tpu.dot_dimension_numbers<[1], [0], [0], [1], [0, 0, 1, 1], [], []>} : vector<16x4xbf16>, vector<4x4xbf16>, vector<16x4xf32> -> vector<16x4xf32>
    %63 = arith.addf %58, %62 : vector<16x4xf32>
    %64 = vector.extract_strided_slice %53 {offsets = [2, 0], sizes = [16, 4], strides = [1, 1]} : vector<18x4xbf16> to vector<16x4xbf16>
    %c1_38 = arith.constant 1 : index
    %c2_39 = arith.constant 2 : index
    %c0_40 = arith.constant 0 : index
    %c0_41 = arith.constant 0 : index
    %65 = vector.load %arg7[%c1_38, %c2_39, %c0_40, %c0_41] : memref<3x3x4x4xbf16, #tpu.memory_space<vmem>>, vector<1x1x4x4xbf16>
    %66 = vector.shape_cast %65 : vector<1x1x4x4xbf16> to vector<4x4xbf16>
    %cst_42 = arith.constant dense<0.000000e+00> : vector<16x4xf32>
    %67 = tpu.matmul %64, %66, %cst_42 {dimension_numbers = #tpu.dot_dimension_numbers<[1], [0], [0], [1], [0, 0, 1, 1], [], []>} : vector<16x4xbf16>, vector<4x4xbf16>, vector<16x4xf32> -> vector<16x4xf32>
    %68 = arith.addf %63, %67 : vector<16x4xf32>
    %c0_43 = arith.constant 0 : index
    %c0_44 = arith.constant 0 : index
    %c0_45 = arith.constant 0 : index
    %c0_46 = arith.constant 0 : index
    %69 = vector.load %arg4[%c0_43, %c0_44, %c0_45, %c0_46] : memref<1x1x18x4xbf16, #tpu.memory_space<vmem>>, vector<1x1x18x4xbf16>
    %70 = vector.shape_cast %69 : vector<1x1x18x4xbf16> to vector<18x4xbf16>
    %71 = arith.extf %70 : vector<18x4xbf16> to vector<18x4xf32>
    %72 = vector.broadcast %8 : vector<1x4xf32> to vector<18x4xf32>
    %73 = arith.mulf %71, %72 : vector<18x4xf32>
    %74 = vector.broadcast %9 : vector<1x4xf32> to vector<18x4xf32>
    %75 = arith.addf %73, %74 : vector<18x4xf32>
    %cst_47 = arith.constant 0.000000e+00 : f32
    %76 = vector.broadcast %cst_47 : f32 to vector<18x4xf32>
    %77 = arith.maximumf %75, %76 : vector<18x4xf32>
    %78 = vector.broadcast %7 : vector<18x1xf32> to vector<18x4xf32>
    %79 = arith.mulf %77, %78 : vector<18x4xf32>
    %c15_i32 = arith.constant 15 : i32
    %80 = arith.cmpi slt, %arg1, %c15_i32 : i32
    %cst_48 = arith.constant 1.000000e+00 : f32
    %cst_49 = arith.constant 0.000000e+00 : f32
    %81 = arith.select %80, %cst_48, %cst_49 : f32
    %82 = vector.broadcast %81 : f32 to vector<18x4xf32>
    %83 = arith.mulf %79, %82 : vector<18x4xf32>
    %84 = arith.truncf %83 : vector<18x4xf32> to vector<18x4xbf16>
    %85 = vector.extract_strided_slice %84 {offsets = [0, 0], sizes = [16, 4], strides = [1, 1]} : vector<18x4xbf16> to vector<16x4xbf16>
    %c2_50 = arith.constant 2 : index
    %c0_51 = arith.constant 0 : index
    %c0_52 = arith.constant 0 : index
    %c0_53 = arith.constant 0 : index
    %86 = vector.load %arg7[%c2_50, %c0_51, %c0_52, %c0_53] : memref<3x3x4x4xbf16, #tpu.memory_space<vmem>>, vector<1x1x4x4xbf16>
    %87 = vector.shape_cast %86 : vector<1x1x4x4xbf16> to vector<4x4xbf16>
    %cst_54 = arith.constant dense<0.000000e+00> : vector<16x4xf32>
    %88 = tpu.matmul %85, %87, %cst_54 {dimension_numbers = #tpu.dot_dimension_numbers<[1], [0], [0], [1], [0, 0, 1, 1], [], []>} : vector<16x4xbf16>, vector<4x4xbf16>, vector<16x4xf32> -> vector<16x4xf32>
    %89 = arith.addf %68, %88 : vector<16x4xf32>
    %90 = vector.extract_strided_slice %84 {offsets = [1, 0], sizes = [16, 4], strides = [1, 1]} : vector<18x4xbf16> to vector<16x4xbf16>
    %c2_55 = arith.constant 2 : index
    %c1_56 = arith.constant 1 : index
    %c0_57 = arith.constant 0 : index
    %c0_58 = arith.constant 0 : index
    %91 = vector.load %arg7[%c2_55, %c1_56, %c0_57, %c0_58] : memref<3x3x4x4xbf16, #tpu.memory_space<vmem>>, vector<1x1x4x4xbf16>
    %92 = vector.shape_cast %91 : vector<1x1x4x4xbf16> to vector<4x4xbf16>
    %cst_59 = arith.constant dense<0.000000e+00> : vector<16x4xf32>
    %93 = tpu.matmul %90, %92, %cst_59 {dimension_numbers = #tpu.dot_dimension_numbers<[1], [0], [0], [1], [0, 0, 1, 1], [], []>} : vector<16x4xbf16>, vector<4x4xbf16>, vector<16x4xf32> -> vector<16x4xf32>
    %94 = arith.addf %89, %93 : vector<16x4xf32>
    %95 = vector.extract_strided_slice %84 {offsets = [2, 0], sizes = [16, 4], strides = [1, 1]} : vector<18x4xbf16> to vector<16x4xbf16>
    %c2_60 = arith.constant 2 : index
    %c2_61 = arith.constant 2 : index
    %c0_62 = arith.constant 0 : index
    %c0_63 = arith.constant 0 : index
    %96 = vector.load %arg7[%c2_60, %c2_61, %c0_62, %c0_63] : memref<3x3x4x4xbf16, #tpu.memory_space<vmem>>, vector<1x1x4x4xbf16>
    %97 = vector.shape_cast %96 : vector<1x1x4x4xbf16> to vector<4x4xbf16>
    %cst_64 = arith.constant dense<0.000000e+00> : vector<16x4xf32>
    %98 = tpu.matmul %95, %97, %cst_64 {dimension_numbers = #tpu.dot_dimension_numbers<[1], [0], [0], [1], [0, 0, 1, 1], [], []>} : vector<16x4xbf16>, vector<4x4xbf16>, vector<16x4xf32> -> vector<16x4xf32>
    %99 = arith.addf %94, %98 : vector<16x4xf32>
    %100 = arith.truncf %99 : vector<16x4xf32> to vector<16x4xbf16>
    %c0_65 = arith.constant 0 : index
    %c0_66 = arith.constant 0 : index
    %c0_67 = arith.constant 0 : index
    %c0_68 = arith.constant 0 : index
    %101 = vector.load %arg8[%c0_65, %c0_66, %c0_67, %c0_68] : memref<1x1x16x4xbf16, #tpu.memory_space<vmem>>, vector<1x1x16x4xbf16>
    %102 = vector.shape_cast %101 : vector<1x1x16x4xbf16> to vector<16x4xbf16>
    %103 = vector.shape_cast %100 : vector<16x4xbf16> to vector<1x1x16x4xbf16>
    tpu.vector_store %arg8[%c0_65, %c0_66, %c0_67, %c0_68], %103 {strides = array<i32>} : memref<1x1x16x4xbf16, #tpu.memory_space<vmem>>, vector<1x1x16x4xbf16>,
    %cst_69 = arith.constant dense<0.000000e+00> : vector<4xf32>
    %104 = vector.multi_reduction <add>, %99, %cst_69 [0] : vector<16x4xf32> to vector<4xf32>
    %105 = vector.shape_cast %104 : vector<4xf32> to vector<1x4xf32>
    %c0_70 = arith.constant 0 : index
    %c0_71 = arith.constant 0 : index
    %c0_72 = arith.constant 0 : index
    %c0_73 = arith.constant 0 : index
    %106 = vector.load %arg9[%c0_70, %c0_71, %c0_72, %c0_73] : memref<1x1x1x4xf32, #tpu.memory_space<vmem>>, vector<1x1x1x4xf32>
    %107 = vector.shape_cast %106 : vector<1x1x1x4xf32> to vector<1x4xf32>
    %108 = vector.shape_cast %105 : vector<1x4xf32> to vector<1x1x1x4xf32>
    tpu.vector_store %arg9[%c0_70, %c0_71, %c0_72, %c0_73], %108 {strides = array<i32>} : memref<1x1x1x4xf32, #tpu.memory_space<vmem>>, vector<1x1x1x4xf32>,
    %109 = arith.mulf %99, %99 : vector<16x4xf32>
    %cst_74 = arith.constant dense<0.000000e+00> : vector<4xf32>
    %110 = vector.multi_reduction <add>, %109, %cst_74 [0] : vector<16x4xf32> to vector<4xf32>
    %111 = vector.shape_cast %110 : vector<4xf32> to vector<1x4xf32>
    %c0_75 = arith.constant 0 : index
    %c0_76 = arith.constant 0 : index
    %c0_77 = arith.constant 0 : index
    %c0_78 = arith.constant 0 : index
    %112 = vector.load %arg10[%c0_75, %c0_76, %c0_77, %c0_78] : memref<1x1x1x4xf32, #tpu.memory_space<vmem>>, vector<1x1x1x4xf32>
    %113 = vector.shape_cast %112 : vector<1x1x1x4xf32> to vector<1x4xf32>
    %114 = vector.shape_cast %111 : vector<1x4xf32> to vector<1x1x1x4xf32>
    tpu.vector_store %arg10[%c0_75, %c0_76, %c0_77, %c0_78], %114 {strides = array<i32>} : memref<1x1x1x4xf32, #tpu.memory_space<vmem>>, vector<1x1x1x4xf32>,
    return
  }
  func.func @transform_0(%arg0: i32, %arg1: i32) -> (i32, i32, i32, i32) {
    %c1_i32 = arith.constant 1 : i32
    %0 = arith.subi %arg1, %c1_i32 : i32
    %c0_i32 = arith.constant 0 : i32
    %1 = arith.maxsi %0, %c0_i32 : i32
    %c0_i32_0 = arith.constant 0 : i32
    %c0_i32_1 = arith.constant 0 : i32
    %c0_i32_2 = arith.constant 0 : i32
    return %arg0, %1, %c0_i32_0, %c0_i32_1 : i32, i32, i32, i32
  }
  func.func @transform_1(%arg0: i32, %arg1: i32) -> (i32, i32, i32, i32) {
    %c0_i32 = arith.constant 0 : i32
    %c0_i32_0 = arith.constant 0 : i32
    %c0_i32_1 = arith.constant 0 : i32
    return %arg0, %arg1, %c0_i32, %c0_i32_0 : i32, i32, i32, i32
  }
  func.func @transform_2(%arg0: i32, %arg1: i32) -> (i32, i32, i32, i32) {
    %c1_i32 = arith.constant 1 : i32
    %0 = arith.addi %arg1, %c1_i32 : i32
    %c15_i32 = arith.constant 15 : i32
    %1 = arith.minsi %0, %c15_i32 : i32
    %c0_i32 = arith.constant 0 : i32
    %c0_i32_0 = arith.constant 0 : i32
    %c0_i32_1 = arith.constant 0 : i32
    return %arg0, %1, %c0_i32, %c0_i32_0 : i32, i32, i32, i32
  }
  func.func @transform_3(%arg0: i32, %arg1: i32) -> (i32, i32) {
    %c0_i32 = arith.constant 0 : i32
    %c0_i32_0 = arith.constant 0 : i32
    %c0_i32_1 = arith.constant 0 : i32
    return %c0_i32, %c0_i32_0 : i32, i32
  }
  func.func @transform_4(%arg0: i32, %arg1: i32) -> (i32, i32) {
    %c0_i32 = arith.constant 0 : i32
    %c0_i32_0 = arith.constant 0 : i32
    %c0_i32_1 = arith.constant 0 : i32
    return %c0_i32, %c0_i32_0 : i32, i32
  }
  func.func @transform_5(%arg0: i32, %arg1: i32) -> (i32, i32, i32, i32) {
    %c0_i32 = arith.constant 0 : i32
    %c0_i32_0 = arith.constant 0 : i32
    %c0_i32_1 = arith.constant 0 : i32
    %c0_i32_2 = arith.constant 0 : i32
    %c0_i32_3 = arith.constant 0 : i32
    return %c0_i32, %c0_i32_0, %c0_i32_1, %c0_i32_2 : i32, i32, i32, i32
  }
  func.func @transform_6(%arg0: i32, %arg1: i32) -> (i32, i32, i32, i32) {
    %c0_i32 = arith.constant 0 : i32
    %c0_i32_0 = arith.constant 0 : i32
    %c0_i32_1 = arith.constant 0 : i32
    return %arg0, %arg1, %c0_i32, %c0_i32_0 : i32, i32, i32, i32
  }
  func.func @transform_7(%arg0: i32, %arg1: i32) -> (i32, i32, i32, i32) {
    %c0_i32 = arith.constant 0 : i32
    %c0_i32_0 = arith.constant 0 : i32
    %c0_i32_1 = arith.constant 0 : i32
    return %arg0, %arg1, %c0_i32, %c0_i32_0 : i32, i32, i32, i32
  }
  func.func @transform_8(%arg0: i32, %arg1: i32) -> (i32, i32, i32, i32) {
    %c0_i32 = arith.constant 0 : i32
    %c0_i32_0 = arith.constant 0 : i32
    %c0_i32_1 = arith.constant 0 : i32
    return %arg0, %arg1, %c0_i32, %c0_i32_0 : i32, i32, i32, i32
  }
}

module attributes {stable_mosaic.version = 11 : i64} {
  func.func @kernel(%arg0: i32, %arg1: i32, %arg2: memref<1x1x16x4xbf16, #tpu.memory_space<vmem>>, %arg3: memref<1x1x18x4xbf16, #tpu.memory_space<vmem>>, %arg4: memref<1x4xf32, #tpu.memory_space<vmem>>, %arg5: memref<1x4xf32, #tpu.memory_space<vmem>>, %arg6: memref<1x1x16x4xbf16, #tpu.memory_space<vmem>>) attributes {dimension_semantics = [#tpu.dimension_semantics<parallel>, #tpu.dimension_semantics<parallel>], iteration_bounds = array<i64: 2, 16>, scalar_prefetch = 0 : i64, scratch_operands = 0 : i64, tpu.core_type = #tpu.core_type<tc>, window_params = [{transform_indices = @transform_0, window_bounds = array<i64: 1, 1, 16, 4>}, {transform_indices = @transform_1, window_bounds = array<i64: 1, 1, 18, 4>}, {pipeline_mode = #tpu.pipeline_mode<synchronous>, transform_indices = @transform_2, window_bounds = array<i64: 1, 4>}, {pipeline_mode = #tpu.pipeline_mode<synchronous>, transform_indices = @transform_3, window_bounds = array<i64: 1, 4>}, {transform_indices = @transform_4, window_bounds = array<i64: 1, 1, 16, 4>}]} {
    %c0 = arith.constant 0 : index
    %c0_0 = arith.constant 0 : index
    %c0_1 = arith.constant 0 : index
    %c0_2 = arith.constant 0 : index
    %0 = vector.load %arg2[%c0, %c0_0, %c0_1, %c0_2] : memref<1x1x16x4xbf16, #tpu.memory_space<vmem>>, vector<1x1x16x4xbf16>
    %1 = vector.shape_cast %0 : vector<1x1x16x4xbf16> to vector<16x4xbf16>
    %2 = arith.extf %1 : vector<16x4xbf16> to vector<16x4xf32>
    %c0_3 = arith.constant 0 : index
    %c0_4 = arith.constant 0 : index
    %3 = vector.load %arg4[%c0_3, %c0_4] : memref<1x4xf32, #tpu.memory_space<vmem>>, vector<1x4xf32>
    %4 = vector.broadcast %3 : vector<1x4xf32> to vector<16x4xf32>
    %5 = arith.mulf %2, %4 : vector<16x4xf32>
    %c0_5 = arith.constant 0 : index
    %c0_6 = arith.constant 0 : index
    %6 = vector.load %arg5[%c0_5, %c0_6] : memref<1x4xf32, #tpu.memory_space<vmem>>, vector<1x4xf32>
    %7 = vector.broadcast %6 : vector<1x4xf32> to vector<16x4xf32>
    %8 = arith.addf %5, %7 : vector<16x4xf32>
    %c0_7 = arith.constant 0 : index
    %c0_8 = arith.constant 0 : index
    %c0_9 = arith.constant 0 : index
    %c0_10 = arith.constant 0 : index
    %9 = vector.load %arg3[%c0_7, %c0_8, %c0_9, %c0_10] : memref<1x1x18x4xbf16, #tpu.memory_space<vmem>>, vector<1x1x18x4xbf16>
    %10 = vector.shape_cast %9 : vector<1x1x18x4xbf16> to vector<18x4xbf16>
    %11 = vector.extract_strided_slice %10 {offsets = [1, 0], sizes = [16, 4], strides = [1, 1]} : vector<18x4xbf16> to vector<16x4xbf16>
    %12 = arith.extf %11 : vector<16x4xbf16> to vector<16x4xf32>
    %13 = arith.addf %8, %12 : vector<16x4xf32>
    %cst = arith.constant 0.000000e+00 : f32
    %14 = vector.broadcast %cst : f32 to vector<16x4xf32>
    %15 = arith.cmpf oge, %13, %14 : vector<16x4xf32>
    %cst_11 = arith.constant 1.000000e-01 : f32
    %16 = vector.broadcast %cst_11 : f32 to vector<16x4xf32>
    %17 = arith.mulf %16, %13 : vector<16x4xf32>
    %18 = arith.select %15, %13, %17 : vector<16x4xi1>, vector<16x4xf32>
    %19 = arith.truncf %18 : vector<16x4xf32> to vector<16x4xbf16>
    %c0_12 = arith.constant 0 : index
    %c0_13 = arith.constant 0 : index
    %c0_14 = arith.constant 0 : index
    %c0_15 = arith.constant 0 : index
    %20 = vector.load %arg6[%c0_12, %c0_13, %c0_14, %c0_15] : memref<1x1x16x4xbf16, #tpu.memory_space<vmem>>, vector<1x1x16x4xbf16>
    %21 = vector.shape_cast %20 : vector<1x1x16x4xbf16> to vector<16x4xbf16>
    %22 = vector.shape_cast %19 : vector<16x4xbf16> to vector<1x1x16x4xbf16>
    tpu.vector_store %arg6[%c0_12, %c0_13, %c0_14, %c0_15], %22 {strides = array<i32>} : memref<1x1x16x4xbf16, #tpu.memory_space<vmem>>, vector<1x1x16x4xbf16>,
    return
  }
  func.func @transform_0(%arg0: i32, %arg1: i32) -> (i32, i32, i32, i32) {
    %c0_i32 = arith.constant 0 : i32
    %c0_i32_0 = arith.constant 0 : i32
    %c0_i32_1 = arith.constant 0 : i32
    return %arg0, %arg1, %c0_i32, %c0_i32_0 : i32, i32, i32, i32
  }
  func.func @transform_1(%arg0: i32, %arg1: i32) -> (i32, i32, i32, i32) {
    %c1_i32 = arith.constant 1 : i32
    %0 = arith.addi %arg1, %c1_i32 : i32
    %c0_i32 = arith.constant 0 : i32
    %c0_i32_0 = arith.constant 0 : i32
    %c0_i32_1 = arith.constant 0 : i32
    return %arg0, %0, %c0_i32, %c0_i32_0 : i32, i32, i32, i32
  }
  func.func @transform_2(%arg0: i32, %arg1: i32) -> (i32, i32) {
    %c0_i32 = arith.constant 0 : i32
    %c0_i32_0 = arith.constant 0 : i32
    %c0_i32_1 = arith.constant 0 : i32
    return %c0_i32, %c0_i32_0 : i32, i32
  }
  func.func @transform_3(%arg0: i32, %arg1: i32) -> (i32, i32) {
    %c0_i32 = arith.constant 0 : i32
    %c0_i32_0 = arith.constant 0 : i32
    %c0_i32_1 = arith.constant 0 : i32
    return %c0_i32, %c0_i32_0 : i32, i32
  }
  func.func @transform_4(%arg0: i32, %arg1: i32) -> (i32, i32, i32, i32) {
    %c0_i32 = arith.constant 0 : i32
    %c0_i32_0 = arith.constant 0 : i32
    %c0_i32_1 = arith.constant 0 : i32
    return %arg0, %arg1, %c0_i32, %c0_i32_0 : i32, i32, i32, i32
  }
}

</mosaic_0001>

<bundles_post_ra>
// kernel: basic_block_enc_forward.3
= control target key start
LH: loop header
LB: loop body
LE: loop exit
PB: predicated region body
PF: predicated region fallthrough
CT: control target
= control target key end

     0   :  { %s1473_s21 = smov 0   ;;  %s1475_s22 = smov 0   ;;  %s1662_s0 = inlined_call_operand.vmem [shape: bf16[2,18,18,4], index: 0, kind: input, shape index: {}, may-alias: {0,1,2}]   ;;  %s1663_s1 = inlined_call_operand.vmem [shape: bf16[2,18,18,4], index: 1, kind: input, shape index: {}, may-alias: {0,1,2}]   ;;  %s1664_s2 = inlined_call_operand.vmem [shape: bf16[2,18,18,4], index: 2, kind: input, shape index: {}, may-alias: {0,1,2}]   ;;  %s1665_s3 = inlined_call_operand.vmem [shape: bf16[3,3,4,4], index: 3, kind: input, shape index: {}]   ;;  %s1666_s4 = inlined_call_operand.vmem [shape: bf16[2,16,18,4], index: 4, kind: output, shape index: {0}]   ;;  %s1667_s5 = inlined_call_operand.vmem [shape: f32[2,16,1,4], index: 5, kind: output, shape index: {1}]   ;;  %s1668_s6 = inlined_call_operand.vmem [shape: f32[2,16,1,4], index: 6, kind: output, shape index: {2}]  }
   0x1   :  { %s1477_s23 = smov 0   ;;  %s1479_s24 = smov 0  }
   0x2   :  { %s1481_s25 = smov 0  }
   0x3 LB: > { %s26_s26 = sadd.s32 1, %s1425_s23  ;;  %s29_s27 = sadd.s32 1, %s1429_s24  ;;  %s1433_s25 = sphi %s1481_s25, %s17_s25   ;;  %s1429_s24 = sphi %s1479_s24, %s1672_s24   ;;  %s1425_s23 = sphi %s1477_s23, %s1671_s23   ;;  %s1421_s22 = sphi %s1475_s22, %s1670_s22   ;;  %s1417_s21 = sphi %s1473_s21, %s1669_s21  }
   0x4   : > { %p27_p0 = scmp.ge.s32.totalorder %s26_s26, 16  ;;  %p1232_p1 = scmp.ge.s32.totalorder %s1433_s25, 1 }
   0x5   : > { %p281_p2 = scmp.lt.s32.totalorder %s1433_s25, 33 }
   0x6   : > { %s1674_s26 = smov (%p27_p0, %s26_s26), 0  ;;  %s1676_s27 = smov (!%p27_p0, %s29_s27), %s1429_s24 }
   0x7   : > { %p282_p3 = pnand %p1232_p1, %p281_p2  ;;  %p31_p4 = scmp.ge.s32.totalorder %s1676_s27, 2 }
   0x8   : > { %p353_p5 = scmp.lt.s32.totalorder (!%p282_p3), %s1421_s22, 1  ;;  %p355_p6 = scmp.lt.s32.totalorder (!%p282_p3), %s1417_s21, 17 }
   0x9   : > { %s1678_s27 = smov (%p31_p4, %s1676_s27), 0  ;;  %285 = sbr.rel (%p282_p3) target bundleno = 280 (0x118), region = 36 }
   0xa   : > { %s362_s11 = sadd.s32 (!%p282_p3), 1, %s1417_s21  ;;  %s373_s19 = sadd.s32 (!%p282_p3), 2, %s1417_s21 }
   0xb   : > { %p365_p7 = scmp.lt.s32.totalorder (!%p282_p3), %s362_s11, 17  ;;  %p376_p8 = scmp.lt.s32.totalorder (!%p282_p3), %s373_s19, 17 }
   0xc   : > { %p386_p9 = scmp.lt.s32.totalorder (!%p282_p3), %s1417_s21, 15 }
   0xe   : > { %v1239_v0 = vld [vmem:[%s1665_s3 + $0x2] sm:$0x3]  ;;  %vm439_vm0 = vcmask 1041408   ;;  %v411_v1 = vld [vmem:[%s1665_s3] sm:$0x3]  ;;  %v1435_v2 = vmov 0.0  }
   0xf   : > { %1286 = vmatprep.subr.bf16.mxu0 %v1435_v2  ;;  %v441_v3 = vsel %vm439_vm0, %v1239_v0, 0  ;;  %1292 = vmatprep.subr.bf16.mxu1 %v1435_v2  ;;  %v487_v4 = vsel %vm439_vm0, %v411_v1, 0  ;;  %vm1436_vm1 = vmmov 0   ;;  %s1680_s22 = smov (!%p353_p5, %s1421_s22), 1  ;;  %v1246_v5 = vld [vmem:[%s1665_s3 + $0x6] sm:$0x3] }
  0x10   : > { %1287 = vmatpush3.bf16.msra.mxu0 %v441_v3  ;;  %1293 = vmatpush3.bf16.msra.mxu1 %v487_v4  ;;  %s356_s8 = scalar_select %p355_p6, %s1417_s21, 17  ;;  %vm435_vm2 = vcmask 31744   ;;  %v599_v8 = vsel %vm439_vm0, %v1246_v5, 0  ;;  %v1244_v14 = vld [vmem:[%s1665_s3 + $0x4] sm:$0x3]  ;;  %vm532_vm4 = vcmask 1046528  }
  0x11   : > { %1288 = vmatprep.mubr.msk.bf16.mxu0 %vm1436_vm1, %v1435_v2  ;;  %1294 = vmatprep.mubr.msk.bf16.mxu1 %vm1436_vm1, %v1435_v2  ;;  %s1530_s9 = smul.u32 54, %s1680_s22  ;;  %s1682_s11 = smov (!%p365_p7, %s362_s11), 17  ;;  %vm422_vm3 = vsmask.f32 7424  ;;  %v1252_v15 = vld [vmem:[%s1665_s3 + $0xa] sm:$0x3] }
  0x12   : > { %1298 = vmatprep.subr.bf16.mxu0 %v1435_v2  ;;  %1304 = vmatprep.subr.bf16.mxu1 %v1435_v2  ;;  %s1340_s10 = smul.u32 3, %s356_s8  ;;  %s1684_s19 = smov (!%p376_p8, %s373_s19), 17  ;;  %v540_v17 = vsel %vm439_vm0, %v1244_v14, 0  ;;  %v718_v20 = vsel %vm439_vm0, %v1252_v15, 0  ;;  %v1249_v25 = vld [vmem:[%s1665_s3 + $0x8] sm:$0x3] }
  0x13   : > { %s1342_s29 = smul.u32 3, %s1682_s11  ;;  %v1257_v35 = vld [vmem:[%s1665_s3 + $0xe] sm:$0x3]  ;;  %v664_v36 = vsel %vm439_vm0, %v1249_v25, 0  ;;  %v1254_v44 = vld [vmem:[%s1665_s3 + $0xc] sm:$0x3] }
  0x14   : > { %s359_s12 = sadd.s32 %s1530_s9, %s1340_s10  ;;  %s1343_s8 = smul.u32 3, %s1684_s19  ;;  %v842_v41 = vsel %vm439_vm0, %v1257_v35, 0  ;;  %v777_v48 = vsel %vm439_vm0, %v1254_v44, 0  ;;  %v1260_v50 = vld [vmem:[%s1665_s3 + $0x10] sm:$0x3]  ;;  %vm941_vm5 = vcmask 27648  }
  0x15   : > { %s1233_s13 = sshll.u32 %s359_s12, 2  ;;  %s369_s10 = sadd.s32 %s1342_s29, %s1530_s9  ;;  %v896_v51 = vsel %vm439_vm0, %v1260_v50, 0  ;;  %v1437_v55 = vmov 0   ;;  %vm944_vm6 = vcmask 24576   ;;  %vm976_vm7 = vsmask.f32 7938 }
  0x16   : > { %s361_s18 = scalar_lea.vmem %s1662_s0, %s1233_s13  ;;  %s1234_s12 = sshll.u32 %s369_s10, 2  ;;  %vm977_vm8 = vmand %vm941_vm5, %vm976_vm7  ;;  %vm952_vm9 = vsmask.f32 256  ;;  %vm953_vm10 = vsmask.f32 4368 }
  0x17   : > { %v1389_v6 = vld [vmem:[%s361_s18] sm:$0xff]   ;;  %v1390_v7 = vld [vmem:[%s361_s18 + $0x8] ss:$0 sps:$4 sm:$0x11]   ;;  %s380_s13 = sadd.s32 %s1343_s8, %s1530_s9  ;;  %s371_s11 = scalar_lea.vmem %s1663_s1, %s1234_s12  ;;  %vm954_vm11 = vmor %vm952_vm9, %vm953_vm10 }
  0x18   : > { %v424_v9 = vshrl.u32 %v1389_v6, 16  ;;  %v426_v10 = vshll.u32 %v1389_v6, 16  ;;  %v431_v11 = vshll.u32 %v1390_v7, 16  ;;  %1295 = vmatmul.mubr.msk.bf16.vlgmr.msra.gmra.mxu1 %vm435_vm2, %v1389_v6  ;;  %v533_v19 = vrot.slane %v1389_v6, 1  ;;  %s1235_s16 = sshll.u32 %s380_s13, 2  ;;  %v1391_v22 = vld [vmem:[%s371_s11] sm:$0xff]   ;;  %vm983_vm12 = vmand %vm944_vm6, %vm952_vm9 }
  0x19   : > { %1305 = vmatpush3.bf16.msra.mxu1 %v599_v8  ;;  %1306 = vmatprep.mubr.msk.bf16.mxu1 %vm1436_vm1, %v1435_v2  ;;  %v534_v21 = vrot.slane %v1390_v7, 1  ;;  %s382_s19 = scalar_lea.vmem %s1664_s2, %s1235_s16  ;;  %v1392_v23 = vld [vmem:[%s371_s11 + $0x8] ss:$0 sps:$4 sm:$0x11]   ;;  %v651_v26 = vshll.u32 %v1391_v22, 16  ;;  %v711_v27 = vrot.slane %v1391_v22, 1 }
  0x1a   : > { %v428_v12 = vrot.slane %v426_v10, 1  ;;  %v433_v13 = vrot.slane %v431_v11, 1  ;;  %1316 = vmatprep.subr.bf16.mxu1 %v1435_v2  ;;  %v1393_v24 = vld [vmem:[%s382_s19] sm:$0xff]   ;;  %v712_v28 = vrot.slane %v1392_v23, 1  ;;  %v649_v32 = vshrl.u32 %v1391_v22, 16  ;;  %s1686_s21 = smov (!%p386_p9, %s1417_s21), 15 }
  0x1b   : > { %v1394_v29 = vld [vmem:[%s382_s19 + $0x8] ss:$0 sps:$4 sm:$0x11]   ;;  %v829_v30 = vshll.u32 %v1393_v24, 16  ;;  %v535_v31 = vsel %vm532_vm4, %v533_v19, %v534_v21  ;;  %v653_v33 = vrot.slane %v651_v26, 1  ;;  %v656_v34 = vshll.u32 %v1392_v23, 16 }
  0x1c   : > { %v429_v16 = vor.u32 %v428_v12, %v424_v9  ;;  %v713_v37 = vsel %vm532_vm4, %v711_v27, %v712_v28  ;;  %v827_v38 = vshrl.u32 %v1393_v24, 16  ;;  %v834_v40 = vshll.u32 %v1394_v29, 16  ;;  %s1345_s12 = smul.u32 48, %s1680_s22  ;;  %s1237_s18 = sshll.u32 %s1680_s22, 4 }
  0x1d   : > { %v831_v39 = vrot.slane %v829_v30, 1  ;;  %v654_v42 = vor.u32 %v653_v33, %v649_v32  ;;  %v658_v43 = vrot.slane %v656_v34, 1  ;;  %v889_v52 = vrot.slane %v1393_v24, 1  ;;  %s1344_s13 = smul.u32 3, %s1686_s21  ;;  %s398_s19 = sadd.s32 %s1237_s18, %s1686_s21 }
  0x1e   : > { %v434_v18 = vsel %vm422_vm3, %v429_v16, %v433_v13  ;;  %v836_v46 = vrot.slane %v834_v40, 1  ;;  %v890_v53 = vrot.slane %v1394_v29, 1  ;;  %s399_s28 = scalar_lea.vmem %s1667_s5, %s398_s19  ;;  %s406_s30 = scalar_lea.vmem %s1668_s6, %s398_s19 }
  0x1f   : > { %1289 = vmatmul.mubr.msk.bf16.vlgmr.msra.gmra.mxu0 %vm435_vm2, %v434_v18  ;;  %v832_v45 = vor.u32 %v831_v39, %v827_v38  ;;  %v659_v47 = vsel %vm422_vm3, %v654_v42, %v658_v43  ;;  %s390_s14 = sadd.s32 %s1345_s12, %s1344_s13 }
  0x20   : > { %1299 = vmatpush3.bf16.msra.mxu0 %v540_v17  ;;  %1300 = vmatprep.mubr.msk.bf16.mxu0 %vm1436_vm1, %v1435_v2  ;;  %v891_v54 = vsel %vm532_vm4, %v889_v52, %v890_v53  ;;  %s1236_s15 = sshll.u32 %s390_s14, 2 }
  0x21   : > { %1310 = vmatprep.subr.bf16.mxu0 %v1435_v2  ;;  %1307 = vmatmul.mubr.msk.bf16.vlgmr.msra.gmra.mxu1 %vm435_vm2, %v1391_v22  ;;  %v837_v49 = vsel %vm422_vm3, %v832_v45, %v836_v46  ;;  %s1617_s17 = scalar_lea.vmem %s1666_s4, %s1236_s15 }
  0x22   : > { %1317 = vmatpush3.bf16.msra.mxu1 %v718_v20  ;;  %1318 = vmatprep.mubr.msk.bf16.mxu1 %vm1436_vm1, %v1435_v2  ;;  %942 = vst.msk [vmem:[%s1617_s17] sm:$0xf] %vm941_vm5, %v1437_v55  ;;  %943 = vst.msk [vmem:[%s1617_s17 + $0x4] sm:$0xf] %vm941_vm5, %v1437_v55 }
  0x23   : > { %1328 = vmatprep.subr.bf16.mxu1 %v1435_v2  ;;  %945 = vst.msk [vmem:[%s1617_s17 + $0x8] sm:$0x1] %vm944_vm6, %v1437_v55 }
  0x27   : > { %1301 = vmatmul.mubr.msk.bf16.vlgmr.msra.gmra.mxu0 %vm435_vm2, %v535_v31 }
  0x28   : > { %1311 = vmatpush3.bf16.msra.mxu0 %v664_v36  ;;  %1312 = vmatprep.mubr.msk.bf16.mxu0 %vm1436_vm1, %v1435_v2 }
  0x29   : > { %1322 = vmatprep.subr.bf16.mxu0 %v1435_v2  ;;  %1319 = vmatmul.mubr.msk.bf16.vlgmr.msra.gmra.mxu1 %vm435_vm2, %v713_v37  ;;  %v978_v53 = vld [vmem:[%s1617_s17] sm:$0xf] }
  0x2a   : > { %1329 = vmatpush3.bf16.msra.mxu1 %v842_v41  ;;  %1330 = vmatprep.mubr.msk.bf16.mxu1 %vm1436_vm1, %v1435_v2 }
  0x2f   : > { %1313 = vmatmul.mubr.msk.bf16.vlgmr.msra.gmra.mxu0 %vm435_vm2, %v659_v47 }
  0x30   : > { %1323 = vmatpush3.bf16.msra.mxu0 %v777_v48  ;;  %1324 = vmatprep.mubr.msk.bf16.mxu0 %vm1436_vm1, %v1435_v2 }
  0x31   : > { %1334 = vmatprep.subr.bf16.mxu0 %v1435_v2  ;;  %1331 = vmatmul.mubr.msk.bf16.vlgmr.msra.gmra.mxu1 %vm435_vm2, %v837_v49 }
  0x37   : > { %1325 = vmatmul.mubr.msk.bf16.vlgmr.msra.gmra.mxu0 %vm435_vm2, %v1393_v24 }
  0x38   : > { %1335 = vmatpush3.bf16.msra.mxu0 %v896_v51  ;;  %1336 = vmatprep.mubr.msk.bf16.mxu0 %vm1436_vm1, %v1435_v2 }
  0x3f   : > { %1337 = vmatmul.mubr.msk.bf16.vlgmr.msra.gmra.mxu0 %vm435_vm2, %v891_v54 }
  0xd8   : > { %v523_v56 = vpop.f32.mrf.mxu1 }
  0xda   : > { %v1296_v57 = vpop.f32.mrf.mxu1 }
  0xdc   : > { %v526_v58 = vpop.f32.mrf.mxu1 }
  0xde   : > { %v1297_v59 = vpop.f32.mrf.mxu1 }
  0xdf   : > { %v477_v60 = vpop.f32.mrf.mxu0 }
  0xe0   : > { %v524_v9 = vadd.f32 %v523_v56, %v477_v60 }
  0xe1   : > { %v1290_v61 = vpop.f32.mrf.mxu0  ;;  %v635_v62 = vpop.f32.mrf.mxu1 }
  0xe3   : > { %v480_v63 = vpop.f32.mrf.mxu0  ;;  %v1308_v0 = vpop.f32.mrf.mxu1 }
  0xe4   : > { %v527_v15 = vadd.f32 %v526_v58, %v480_v63  ;;  %v984_v0 = vld [vmem:[%s1617_s17 + $0x8] sm:$0x1] }
  0xe5   : > { %v1291_v1 = vpop.f32.mrf.mxu0  ;;  %v638_v2 = vpop.f32.mrf.mxu1 }
  0xe7   : > { %v576_v3 = vpop.f32.mrf.mxu0  ;;  %v1309_v4 = vpop.f32.mrf.mxu1 }
  0xe8   : > { %v583_v12 = vadd.f32 %v576_v3, %v524_v9 }
  0xe9   : > { %v1302_v5 = vpop.f32.mrf.mxu0  ;;  %v754_v6 = vpop.f32.mrf.mxu1 }
  0xea   : > { %v642_v18 = vadd.f32 %v635_v62, %v583_v12 }
  0xeb   : > { %v579_v7 = vpop.f32.mrf.mxu0  ;;  %v1320_v8 = vpop.f32.mrf.mxu1 }
  0xec   : > { %v584_v19 = vadd.f32 %v579_v7, %v527_v15 }
  0xed   : > { %v1303_v10 = vpop.f32.mrf.mxu0  ;;  %v757_v11 = vpop.f32.mrf.mxu1 }
  0xee   : > { %v643_v25 = vadd.f32 %v638_v2, %v584_v19 }
  0xef   : > { %v700_v13 = vpop.f32.mrf.mxu0  ;;  %v1321_v14 = vpop.f32.mrf.mxu1 }
  0xf0   : > { %v707_v22 = vadd.f32 %v700_v13, %v642_v18 }
  0xf1   : > { %v1314_v16 = vpop.f32.mrf.mxu0  ;;  %v878_v17 = vpop.f32.mrf.mxu1 }
  0xf2   : > { %v761_v28 = vadd.f32 %v754_v6, %v707_v22 }
  0xf3   : > { %v703_v20 = vpop.f32.mrf.mxu0  ;;  %v1332_v21 = vpop.f32.mrf.mxu1 }
  0xf4   : > { %v708_v29 = vadd.f32 %v703_v20, %v643_v25 }
  0xf5   : > { %v1315_v23 = vpop.f32.mrf.mxu0  ;;  %v881_v24 = vpop.f32.mrf.mxu1 }
  0xf6   : > { %v762_v33 = vadd.f32 %v757_v11, %v708_v29 }
  0xf7   : > { %v813_v26 = vpop.f32.mrf.mxu0  ;;  %v1333_v27 = vpop.f32.mrf.mxu1 }
  0xf8   : > { %v820_v31 = vadd.f32 %v813_v26, %v761_v28 }
  0xf9   : > { %v1326_v30 = vpop.f32.mrf.mxu0 }
  0xfa   : > { %v885_v35 = vadd.f32 %v878_v17, %v820_v31 }
  0xfb   : > { %v816_v32 = vpop.f32.mrf.mxu0 }
  0xfc   : > { %v821_v36 = vadd.f32 %v816_v32, %v762_v33 }
  0xfd   : > { %v1327_v34 = vpop.f32.mrf.mxu0 }
  0xfe   : > { %v886_v40 = vadd.f32 %v881_v24, %v821_v36 }
  0xff   : > { %v932_v37 = vpop.f32.mrf.mxu0 }
 0x100   : > { %v939_v38 = vadd.f32 %v932_v37, %v885_v35 }
 0x101   : > { %v1338_v39 = vpop.f32.mrf.mxu0 }
 0x102   : > { %v1266_v41 = vpack.c.bf16 %v939_v38, %v939_v38  ;;  %v987_v46 = vsel %vm435_vm2, %v939_v38, 0.0  ;;  %v997_v47 = vmul.f32 %v939_v38, %v939_v38 }
 0x103   : > { %v935_v42 = vpop.f32.mrf.mxu0 }
 0x104   : > { %v956_v43 = vshrl.u32 %v1266_v41, 16  ;;  %v940_v44 = vadd.f32 %v935_v42, %v886_v40  ;;  %v959_v45 = vshll.u32 %v1266_v41, 16  ;;  %v999_v57 = vsel %vm435_vm2, %v997_v47, 0.0 }
 0x105   : > { %v1339_v48 = vpop.f32.mrf.mxu0 }
 0x106   : > { %v958_v49 = vrot.slane %v956_v43, 7  ;;  %v1267_v50 = vpack.c.bf16 %v940_v44, %v940_v44  ;;  %v988_v51 = vsel %vm435_vm2, %v940_v44, 0.0  ;;  %v998_v52 = vmul.f32 %v940_v44, %v940_v44 }
 0x107   : > { %v989_v54 = vadd.f32 %v988_v51, %v987_v46 }
 0x108   : > { %v961_v55 = vor.u32 %v959_v45, %v958_v49  ;;  %v964_v56 = vshrl.u32 %v1267_v50, 16  ;;  %v1000_v59 = vsel %vm435_vm2, %v998_v52, 0.0  ;;  %v967_v62 = vshll.u32 %v1267_v50, 16 }
 0x109   : > { %v990_v58 = vrot.slane %v989_v54, 4  ;;  %v1001_v63 = vadd.f32 %v1000_v59, %v999_v57  ;;  %v962_v2 = vrot.slane %v958_v49, 4 }
 0x10a   : > { %v979_v60 = vsel %vm977_vm8, %v961_v55, %v978_v53  ;;  %v966_v61 = vrot.slane %v964_v56, 7 }
 0x10b   : > { %980 = vst [vmem:[%s1617_s17] sm:$0xf] %v979_v60  ;;  %v991_v1 = vadd.f32 %v990_v58, %v989_v54  ;;  %v1002_v5 = vrot.slane %v1001_v63, 4 }
 0x10c   : > { %v969_v3 = vor.u32 %v967_v62, %v966_v61  ;;  %v971_v4 = vrot.slane %v966_v61, 4 }
 0x10d   : > { %v992_v6 = vrot.slane %v991_v1, 2  ;;  %v1003_v9 = vadd.f32 %v1002_v5, %v1001_v63 }
 0x10e   : > { %v970_v7 = vsel %vm954_vm11, %v962_v2, %v969_v3  ;;  %v985_v8 = vsel %vm983_vm12, %v971_v4, %v984_v0 }
 0x10f   : > { %981 = vst.msk [vmem:[%s1617_s17 + $0x4] sm:$0xf] %vm941_vm5, %v970_v7  ;;  %986 = vst [vmem:[%s1617_s17 + $0x8] sm:$0x1] %v985_v8  ;;  %v993_v10 = vadd.f32 %v992_v6, %v991_v1  ;;  %v1004_v11 = vrot.slane %v1003_v9, 2 }
 0x111   : > { %v994_v12 = vrot.slane %v993_v10, 1  ;;  %v1005_v13 = vadd.f32 %v1004_v11, %v1003_v9 }
 0x113   : > { %v995_v14 = vadd.f32 %v994_v12, %v993_v10  ;;  %v1006_v15 = vrot.slane %v1005_v13, 1 }
 0x115   : > { %996 = vst.msk [vmem:[%s399_s28] sm:$0x1] %vm944_vm6, %v995_v14  ;;  %v1007_v16 = vadd.f32 %v1006_v15, %v1005_v13 }
 0x117   : > { %1008 = vst.msk [vmem:[%s406_s30] sm:$0x1] %vm944_vm6, %v1007_v16 }
 0x118 PF: > { %s17_s25 = sadd.s32 1, %s1433_s25   ;;  %s1669_s21 = smov %s1425_s23 }
 0x119   : > { %p14_p10 = scmp.ge.s32.totalorder %s17_s25, 34   ;;  %s1670_s22 = smov %s1429_s24 }
 0x11a   : > { %s1671_s23 = smov %s1674_s26  ;;  %s1672_s24 = smov %s1678_s27 }
 0x11b   :  { %16 = sbr.rel (!%p14_p10) target bundleno = 3 (0x3), region = 104 }

// kernel: basic_block_enc_forward.5
= control target key start
LH: loop header
LB: loop body
LE: loop exit
PB: predicated region body
PF: predicated region fallthrough
CT: control target
= control target key end

     0   :  { %s584_s15 = smov 0   ;;  %s586_s16 = smov 0   ;;  %s651_s0 = inlined_call_operand.vmem [shape: bf16[2,16,16,4], index: 0, kind: input, shape index: {}]   ;;  %s652_s1 = inlined_call_operand.vmem [shape: bf16[2,18,18,4], index: 1, kind: input, shape index: {}]   ;;  %s653_s2 = inlined_call_operand.vmem [shape: f32[1,4], index: 2, kind: input, shape index: {}]   ;;  %s654_s3 = inlined_call_operand.vmem [shape: f32[1,4], index: 3, kind: input, shape index: {}]   ;;  %s655_s4 = inlined_call_operand.vmem [shape: bf16[2,16,16,4], index: 4, kind: output, shape index: {}]  }
   0x1   :  { %s588_s17 = smov 0   ;;  %s590_s18 = smov 0  }
   0x2   :  { %s592_s19 = smov 0  }
   0x3 LB: > { %s23_s20 = sadd.s32 1, %s549_s17  ;;  %s26_s21 = sadd.s32 1, %s553_s18  ;;  %s557_s19 = sphi %s592_s19, %s14_s19   ;;  %s553_s18 = sphi %s590_s18, %s659_s18   ;;  %s549_s17 = sphi %s588_s17, %s658_s17   ;;  %s545_s16 = sphi %s586_s16, %s657_s16   ;;  %s541_s15 = sphi %s584_s15, %s656_s15  }
   0x4   : > { %p24_p0 = scmp.ge.s32.totalorder %s23_s20, 16  ;;  %p453_p1 = scmp.ge.s32.totalorder %s557_s19, 1 }
   0x5   : > { %p202_p2 = scmp.lt.s32.totalorder %s557_s19, 33 }
   0x6   : > { %s661_s20 = smov (%p24_p0, %s23_s20), 0  ;;  %s663_s21 = smov (!%p24_p0, %s26_s21), %s553_s18 }
   0x7   : > { %p203_p3 = pnand %p453_p1, %p202_p2  ;;  %p28_p4 = scmp.ge.s32.totalorder %s663_s21, 2 }
   0x8   : > { %p246_p5 = scmp.lt.s32.totalorder (!%p203_p3), %s545_s16, 1  ;;  %p248_p6 = scmp.lt.s32.totalorder (!%p203_p3), %s541_s15, 15 }
   0x9   : > { %s665_s21 = smov (%p28_p4, %s663_s21), 0  ;;  %206 = sbr.rel (%p203_p3) target bundleno = 37 (0x25), region = 36 }
   0xa   : > { %s255_s22 = sadd.s32 (!%p203_p3), 1, %s541_s15 }
   0xb   : > { %p258_p7 = scmp.lt.s32.totalorder (!%p203_p3), %s255_s22, 17 }
   0xe   : > { %s667_s16 = smov (!%p246_p5, %s545_s16), 1  ;;  %s669_s15 = smov (!%p248_p6, %s541_s15), 15  ;;  %v461_v3 = vld [vmem:[%s653_s2] ss:$0 sm:$0xff]  ;;  %vm306_vm0 = vcmask 1046528   ;;  %vm330_vm3 = vcmask 27648  }
   0xf   : > { %s455_s23 = sshll.u32 %s667_s16, 5  ;;  %s454_s24 = sshll.u32 %s669_s15, 1  ;;  %v462_v6 = vld [vmem:[%s654_s3] ss:$0 sm:$0xff] }
  0x10   : > { %s614_s25 = sadd.s32 %s455_s23, %s454_s24  ;;  %s478_s30 = smul.u32 54, %s667_s16 }
  0x11   : > { %s456_s26 = sshll.u32 %s614_s25, 2  ;;  %s671_s22 = smov (!%p258_p7, %s255_s22), 17 }
  0x12   : > { %s254_s29 = scalar_lea.vmem %s651_s0, %s456_s26  ;;  %s477_s5 = smul.u32 3, %s671_s22 }
  0x13   : > { %v470_v0 = vld [vmem:[%s254_s29] sm:$0xff]   ;;  %s274_s22 = scalar_lea.vmem %s655_s4, %s456_s26 }
  0x14   : > { %v471_v1 = vunpack.c.l.bf16 %v470_v0  ;;  %v472_v2 = vunpack.c.h.bf16 %v470_v0  ;;  %s262_s8 = sadd.s32 %s478_s30, %s477_s5 }
  0x15   : > { %s457_s9 = sshll.u32 %s262_s8, 2 }
  0x16   : > { %v286_v4 = vmul.f32 %v471_v1, %v461_v3  ;;  %v287_v5 = vmul.f32 %v472_v2, %v461_v3  ;;  %s264_s12 = scalar_lea.vmem %s652_s1, %s457_s9 }
  0x17   : > { %v474_v7 = vld [vmem:[%s264_s12] sm:$0xff]   ;;  %v299_v8 = vld [vmem:[%s264_s12 + $0x8] sm:$0x1] }
  0x18   : > { %v475_v9 = vunpack.c.l.bf16 %v474_v7  ;;  %v476_v10 = vunpack.c.h.bf16 %v474_v7  ;;  %v302_v11 = vunpack.c.l.bf16 %v299_v8  ;;  %v295_v12 = vadd.f32 %v462_v6, %v286_v4 }
  0x19   : > { %v296_v13 = vadd.f32 %v462_v6, %v287_v5 }
  0x1a   : > { %v307_v14 = vrot.slane %v475_v9, 1  ;;  %v308_v15 = vrot.slane %v476_v10, 1  ;;  %v310_v16 = vrot.slane %v302_v11, 1 }
  0x1c   : > { %v309_v17 = vsel %vm306_vm0, %v307_v14, %v308_v15  ;;  %v311_v18 = vsel %vm306_vm0, %v308_v15, %v310_v16 }
  0x1d   : > { %v314_v19 = vadd.f32 %v309_v17, %v295_v12  ;;  %v315_v20 = vadd.f32 %v311_v18, %v296_v13 }
  0x1f   : > { %vm316_vm1 = vcmp.ge.f32.partialorder %v314_v19, 0.0  ;;  %v318_v21 = vmul.f32 0.1, %v314_v19  ;;  %vm317_vm2 = vcmp.ge.f32.partialorder %v315_v20, 0.0  ;;  %v319_v22 = vmul.f32 0.1, %v315_v20 }
  0x21   : > { %v320_v23 = vsel %vm316_vm1, %v314_v19, %v318_v21  ;;  %v321_v24 = vsel %vm317_vm2, %v315_v20, %v319_v22 }
  0x22   : > { %v467_v25 = vpack.c.bf16 %v320_v23, %v320_v23  ;;  %v468_v26 = vpack.c.bf16 %v321_v24, %v321_v24 }
  0x24   : > { %331 = vst.msk [vmem:[%s274_s22] sm:$0xf] %vm330_vm3, %v467_v25  ;;  %332 = vst.msk [vmem:[%s274_s22 + $0x4] sm:$0xf] %vm330_vm3, %v468_v26 }
  0x25 PF: > { %s14_s19 = sadd.s32 1, %s557_s19   ;;  %s656_s15 = smov %s549_s17 }
  0x26   : > { %p11_p8 = scmp.ge.s32.totalorder %s14_s19, 34   ;;  %s657_s16 = smov %s553_s18 }
  0x27   : > { %s658_s17 = smov %s661_s20  ;;  %s659_s18 = smov %s665_s21 }
  0x28   :  { %13 = sbr.rel (!%p11_p8) target bundleno = 3 (0x3), region = 69 }

// kernel: basic_block_enc_forward.4
= control target key start
LH: loop header
LB: loop body
LE: loop exit
PB: predicated region body
PF: predicated region fallthrough
CT: control target
= control target key end

     0   :  { %s1624_s27 = smov 0   ;;  %s1626_s28 = smov 0   ;;  %s1850_s0 = inlined_call_operand.vmem [shape: bf16[2,16,18,4], index: 0, kind: input, shape index: {}, may-alias: {0,1,2}]   ;;  %s1851_s1 = inlined_call_operand.vmem [shape: bf16[2,16,18,4], index: 1, kind: input, shape index: {}, may-alias: {0,1,2}]   ;;  %s1852_s2 = inlined_call_operand.vmem [shape: bf16[2,16,18,4], index: 2, kind: input, shape index: {}, may-alias: {0,1,2}]   ;;  %s1853_s3 = inlined_call_operand.vmem [shape: f32[1,4], index: 3, kind: input, shape index: {}]   ;;  %s1854_s4 = inlined_call_operand.vmem [shape: f32[1,4], index: 4, kind: input, shape index: {}]   ;;  %s1855_s5 = inlined_call_operand.vmem [shape: bf16[3,3,4,4], index: 5, kind: input, shape index: {}]   ;;  %s1856_s6 = inlined_call_operand.vmem [shape: bf16[2,16,16,4], index: 6, kind: output, shape index: {0}]   ;;  %s1857_s7 = inlined_call_operand.vmem [shape: f32[2,16,1,4], index: 7, kind: output, shape index: {1}]   ;;  %s1858_s8 = inlined_call_operand.vmem [shape: f32[2,16,1,4], index: 8, kind: output, shape index: {2}]  }
   0x1   :  { %s1628_s29 = smov 0   ;;  %s1630_s30 = smov 0  }
   0x2   :  { %s1632_s9 = smov 0  }
   0x3 LB: > { %s28_s10 = sadd.s32 1, %s1567_s29  ;;  %s31_s11 = sadd.s32 1, %s1571_s30  ;;  %s1575_s9 = sphi %s1632_s9, %s19_s9   ;;  %s1571_s30 = sphi %s1630_s30, %s1863_s30   ;;  %s1567_s29 = sphi %s1628_s29, %s1862_s29   ;;  %s1563_s28 = sphi %s1626_s28, %s1861_s28   ;;  %s1559_s27 = sphi %s1624_s27, %s1860_s27  }
   0x4   : > { %p29_p0 = scmp.ge.s32.totalorder %s28_s10, 16  ;;  %p1360_p1 = scmp.ge.s32.totalorder %s1575_s9, 1 }
   0x5   : > { %p347_p2 = scmp.lt.s32.totalorder %s1575_s9, 33 }
   0x6   : > { %s1865_s10 = smov (%p29_p0, %s28_s10), 0  ;;  %s1867_s11 = smov (!%p29_p0, %s31_s11), %s1571_s30 }
   0x7   : > { %p348_p3 = pnand %p1360_p1, %p347_p2  ;;  %p33_p4 = scmp.ge.s32.totalorder %s1867_s11, 2 }
   0x8   : > { %s1361_s16 = sadd.s32 (!%p348_p3), 4294967295, %s1559_s27  ;;  %p430_p5 = scmp.lt.s32.totalorder (!%p348_p3), %s1563_s28, 1 }
   0x9   : > { %s1869_s11 = smov (%p33_p4, %s1867_s11), 0  ;;  %351 = sbr.rel (%p348_p3) target bundleno = 294 (0x126), region = 44 }
   0xa   : > { %p428_p6 = scmp.gt.s32.totalorder (!%p348_p3), %s1361_s16, 0  ;;  %p1362_p7 = scmp.lt.s32.totalorder (!%p348_p3), %s1361_s16, 15 }
   0xb   : > { %p541_p8 = scmp.gt.s32.totalorder (!%p348_p3), %s1559_s27, 0  ;;  %p444_p9 = scmp.lt.s32.totalorder (!%p348_p3), %s1559_s27, 15 }
   0xc   : > { %s451_s20 = sadd.s32 (!%p348_p3), 1, %s1559_s27 }
   0xd   : > { %p1688_p10 = scmp.lt.s32.totalorder (!%p348_p3), %s451_s20, 15 }
   0xe   : > { %v1382_v0 = vld [vmem:[%s1855_s5 + $0x2] sm:$0x3]  ;;  %vm569_vm0 = vcmask 1041408   ;;  %v549_v1 = vld [vmem:[%s1855_s5] sm:$0x3]  ;;  %v1577_v2 = vmov 0.0   ;;  %v490_v5 = vlaneseq }
   0xf   : > { %1437 = vmatprep.subr.bf16.mxu0 %v1577_v2  ;;  %v571_v3 = vsel %vm569_vm0, %v1382_v0, 0  ;;  %1443 = vmatprep.subr.bf16.mxu1 %v1577_v2  ;;  %v617_v4 = vsel %vm569_vm0, %v549_v1, 0  ;;  %vm1578_vm1 = vmmov 0   ;;  %s1871_s28 = smov (!%p430_p5, %s1563_s28), 1  ;;  %s1873_s16 = smov (!%p428_p6, %s1361_s16), 0  ;;  %vm565_vm4 = vcmask 31744  }
  0x10   : > { %1438 = vmatpush3.bf16.msra.mxu0 %v571_v3  ;;  %1444 = vmatpush3.bf16.msra.mxu1 %v617_v4  ;;  %s1680_s17 = smul.u32 48, %s1871_s28  ;;  %s1875_s16 = smov (!%p1362_p7, %s1873_s16), 15  ;;  %v491_v6 = vshrl.u32 %v490_v5, 7  ;;  %v1698_v8 = vld [vmem:[%s1853_s3] ss:$0 sm:$0xff]  ;;  %vm664_vm6 = vcmask 1046528  }
  0x11   : > { %1439 = vmatprep.mubr.msk.bf16.mxu0 %vm1578_vm1, %v1577_v2  ;;  %1445 = vmatprep.mubr.msk.bf16.mxu1 %vm1578_vm1, %v1577_v2  ;;  %s1683_s18 = scalar_select %p541_p8, 1.0, 0.0  ;;  %v1710_v14 = vld [vmem:[%s1854_s4] ss:$0 sm:$0xff]  ;;  %v1387_v35 = vld [vmem:[%s1855_s5 + $0x6] sm:$0x3] }
  0x12   : > { %1449 = vmatprep.subr.bf16.mxu0 %v1577_v2  ;;  %1455 = vmatprep.subr.bf16.mxu1 %v1577_v2  ;;  %s1491_s19 = smul.u32 3, %s1875_s16  ;;  %v493_v7 = vadd.s32 16, %v491_v6  ;;  %s1877_s20 = smov (!%p1688_p10, %s451_s20), 15  ;;  %vm494_vm2 = vcmp.ge.s32.totalorder %v491_v6, 1  ;;  %v743_v45 = vsel %vm569_vm0, %v1387_v35, 0  ;;  %vm1109_vm7 = vcmask 27648  }
  0x13   : > { %s1703_s14 = scalar_select %p444_p9, %s1559_s27, 15  ;;  %v1723_v21 = vsel %vm494_vm2, 1.0, %v1577_v2  ;;  %v543_v23 = vstv %s1683_s18  ;;  %v1385_v0 = vld [vmem:[%s1855_s5 + $0x4] sm:$0x3]  ;;  %vm552_vm5 = vsmask.f32 7424 }
  0x14   : > { %s436_s21 = sadd.s32 %s1680_s17, %s1491_s19  ;;  %vm499_vm3 = vcmp.le.s32.totalorder %v493_v7, 16  ;;  %s1879_s20 = smov (!%p1688_p10, %s1877_s20), 15  ;;  %vm1121_vm8 = vcmask 24576  }
  0x15   : > { %s1367_s23 = sshll.u32 %s436_s21, 2  ;;  %s1493_s19 = smul.u32 3, %s1703_s14  ;;  %v1726_v22 = vsel %vm499_vm3, 1.0, %v1577_v2 }
  0x16   : > { %s438_s26 = scalar_lea.vmem %s1850_s0, %s1367_s23  ;;  %s1494_s24 = smul.u32 3, %s1879_s20 }
  0x17   : > { %v1408_v9 = vld [vmem:[%s438_s26] sm:$0xff]   ;;  %v513_v10 = vld [vmem:[%s438_s26 + $0x8] sm:$0x1]  ;;  %s448_s21 = sadd.s32 %s1493_s19, %s1680_s17  ;;  %s1373_s16 = sshll.u32 %s1703_s14, 1 }
  0x18   : > { %v1409_v11 = vunpack.c.l.bf16 %v1408_v9  ;;  %v1410_v12 = vunpack.c.h.bf16 %v1408_v9  ;;  %v516_v13 = vunpack.c.l.bf16 %v513_v10  ;;  %s1368_s23 = sshll.u32 %s448_s21, 2  ;;  %s460_s12 = sadd.s32 %s1494_s24, %s1680_s17  ;;  %v1391_v10 = vld [vmem:[%s1855_s5 + $0xa] sm:$0x3] }
  0x19   : > { %s450_s26 = scalar_lea.vmem %s1851_s1, %s1368_s23  ;;  %s1372_s20 = sshll.u32 %s460_s12, 2 }
  0x1a   : > { %v523_v15 = vmul.f32 %v1409_v11, %v1698_v8  ;;  %v524_v16 = vmul.f32 %v1410_v12, %v1698_v8  ;;  %v525_v17 = vmul.f32 %v1698_v8, %v516_v13  ;;  %v1412_v27 = vld [vmem:[%s450_s26] sm:$0xff]   ;;  %v719_v28 = vld [vmem:[%s450_s26 + $0x8] sm:$0x1]  ;;  %s462_s19 = scalar_lea.vmem %s1852_s2, %s1372_s20  ;;  %v672_v13 = vsel %vm569_vm0, %v1385_v0, 0  ;;  %s1376_s25 = sshll.u32 %s1871_s28, 4 }
  0x1b   : > { %v1413_v29 = vunpack.c.l.bf16 %v1412_v27  ;;  %v1414_v30 = vunpack.c.h.bf16 %v1412_v27  ;;  %v722_v31 = vunpack.c.l.bf16 %v719_v28  ;;  %v1416_v39 = vld [vmem:[%s462_s19] sm:$0xff]   ;;  %v908_v44 = vld [vmem:[%s462_s19 + $0x8] sm:$0x1]  ;;  %s925_s17 = scalar_select %p444_p9, 1.0, 0.0 }
  0x1c   : > { %v532_v18 = vadd.f32 %v1710_v14, %v523_v15  ;;  %v533_v19 = vadd.f32 %v1710_v14, %v524_v16  ;;  %v534_v20 = vadd.f32 %v1710_v14, %v525_v17  ;;  %v1417_v42 = vunpack.c.l.bf16 %v1416_v39  ;;  %s1374_s19 = sshll.u32 %s1871_s28, 5  ;;  %s480_s22 = sadd.s32 %s1376_s25, %s1703_s14 }
  0x1d   : > { %v723_v36 = vmul.f32 %v1413_v29, %v1698_v8  ;;  %v724_v37 = vmul.f32 %v1414_v30, %v1698_v8  ;;  %v725_v38 = vmul.f32 %v1698_v8, %v722_v31  ;;  %v1418_v43 = vunpack.c.h.bf16 %v1416_v39  ;;  %s481_s20 = scalar_lea.vmem %s1857_s7, %s480_s22  ;;  %s488_s15 = scalar_lea.vmem %s1858_s8, %s480_s22 }
  0x1e   : > { %v535_v24 = vmax.f32 %v532_v18, 0.0  ;;  %v536_v25 = vmax.f32 %v533_v19, 0.0  ;;  %v537_v26 = vmax.f32 %v534_v20, 0.0  ;;  %v912_v51 = vmul.f32 %v1417_v42, %v1698_v8 }
  0x1f   : > { %v726_v46 = vadd.f32 %v1710_v14, %v723_v36  ;;  %v727_v47 = vadd.f32 %v1710_v14, %v724_v37  ;;  %v728_v48 = vadd.f32 %v1710_v14, %v725_v38  ;;  %v913_v52 = vmul.f32 %v1418_v43, %v1698_v8 }
  0x20   : > { %v538_v32 = vmul.f32 %v1723_v21, %v535_v24  ;;  %v540_v33 = vmul.f32 %v1726_v22, %v537_v26  ;;  %v545_v34 = vmul.f32 %v543_v23, %v536_v25  ;;  %v911_v55 = vunpack.c.l.bf16 %v908_v44  ;;  %v1389_v25 = vld [vmem:[%s1855_s5 + $0x8] sm:$0x3]  ;;  %v1393_v44 = vld [vmem:[%s1855_s5 + $0xc] sm:$0x3] }
  0x21   : > { %v729_v53 = vmax.f32 %v726_v46, 0.0  ;;  %v731_v54 = vmax.f32 %v728_v48, 0.0  ;;  %v730_v59 = vmax.f32 %v727_v47, 0.0  ;;  %v915_v61 = vadd.f32 %v1710_v14, %v912_v51 }
  0x22   : > { %v544_v40 = vmul.f32 %v543_v23, %v538_v32  ;;  %v546_v41 = vmul.f32 %v543_v23, %v540_v33  ;;  %v916_v1 = vadd.f32 %v1710_v14, %v913_v52  ;;  %v914_v3 = vmul.f32 %v1698_v8, %v911_v55 }
  0x23   : > { %v732_v60 = vmul.f32 %v1723_v21, %v729_v53  ;;  %v734_v4 = vmul.f32 %v1726_v22, %v731_v54  ;;  %v918_v5 = vmax.f32 %v915_v61, 0.0  ;;  %v926_v6 = vstv %s925_s17  ;;  %s472_s17 = sadd.s32 %s1374_s19, %s1373_s16 }
  0x24   : > { %v547_v49 = vpack.c.bf16 %v545_v34, %v544_v40  ;;  %v548_v50 = vpack.c.bf16 %v546_v41, %v546_v41  ;;  %v919_v11 = vmax.f32 %v916_v1, 0.0  ;;  %v917_v12 = vadd.f32 %v1710_v14, %v914_v3  ;;  %s1375_s21 = sshll.u32 %s472_s17, 2 }
  0x25   : > { %v735_v9 = vpack.c.bf16 %v730_v59, %v732_v60  ;;  %v921_v8 = vmul.f32 %v1723_v21, %v918_v5  ;;  %v861_v19 = vsel %vm569_vm0, %v1391_v10, 0  ;;  %v736_v14 = vpack.c.bf16 %v734_v4, %v734_v4  ;;  %s474_s24 = scalar_lea.vmem %s1856_s6, %s1375_s21 }
  0x26   : > { %v554_v56 = vshrl.u32 %v547_v49, 16  ;;  %v556_v57 = vshll.u32 %v547_v49, 16  ;;  %v561_v58 = vshll.u32 %v548_v50, 16  ;;  %1446 = vmatmul.mubr.msk.bf16.vlgmr.msra.gmra.mxu1 %vm565_vm4, %v547_v49  ;;  %v928_v16 = vmul.f32 %v926_v6, %v919_v11 }
  0x27   : > { %1456 = vmatpush3.bf16.msra.mxu1 %v743_v45  ;;  %1457 = vmatprep.mubr.msk.bf16.mxu1 %vm1578_vm1, %v1577_v2  ;;  %v665_v17 = vrot.slane %v547_v49, 1  ;;  %v666_v18 = vrot.slane %v548_v50, 1  ;;  %v920_v20 = vmax.f32 %v917_v12, 0.0  ;;  %v792_v23 = vshll.u32 %v735_v9, 16  ;;  %v1397_v50 = vld [vmem:[%s1855_s5 + $0x10] sm:$0x3] }
  0x28   : > { %v558_v62 = vrot.slane %v556_v57, 1  ;;  %v563_v63 = vrot.slane %v561_v58, 1  ;;  %1467 = vmatprep.subr.bf16.mxu1 %v1577_v2  ;;  %v927_v24 = vmul.f32 %v926_v6, %v921_v8  ;;  %v854_v26 = vrot.slane %v735_v9, 1 }
  0x29   : > { %v923_v21 = vmul.f32 %v1726_v22, %v920_v20  ;;  %v855_v27 = vrot.slane %v736_v14, 1  ;;  %v667_v29 = vsel %vm664_vm6, %v665_v17, %v666_v18  ;;  %v790_v31 = vshrl.u32 %v735_v9, 16  ;;  %v1395_v22 = vld [vmem:[%s1855_s5 + $0xe] sm:$0x3] }
  0x2a   : > { %v559_v7 = vor.u32 %v558_v62, %v554_v56  ;;  %v930_v28 = vpack.c.bf16 %v928_v16, %v927_v24  ;;  %v794_v32 = vrot.slane %v792_v23, 1  ;;  %v797_v33 = vshll.u32 %v736_v14, 16 }
  0x2b   : > { %v929_v30 = vmul.f32 %v926_v6, %v923_v21  ;;  %v805_v35 = vsel %vm569_vm0, %v1389_v25, 0  ;;  %v856_v37 = vsel %vm664_vm6, %v854_v26, %v855_v27  ;;  %v1000_v40 = vsel %vm569_vm0, %v1395_v22, 0 }
  0x2c   : > { %v564_v15 = vsel %vm552_vm5, %v559_v7, %v563_v63  ;;  %v987_v34 = vshll.u32 %v930_v28, 16  ;;  %v985_v38 = vshrl.u32 %v930_v28, 16  ;;  %v795_v42 = vor.u32 %v794_v32, %v790_v31 }
  0x2d   : > { %1440 = vmatmul.mubr.msk.bf16.vlgmr.msra.gmra.mxu0 %vm565_vm4, %v564_v15  ;;  %v931_v36 = vpack.c.bf16 %v929_v30, %v929_v30  ;;  %v799_v43 = vrot.slane %v797_v33, 1  ;;  %v938_v48 = vsel %vm569_vm0, %v1393_v44, 0  ;;  %v1056_v51 = vsel %vm569_vm0, %v1397_v50, 0 }
  0x2e   : > { %1450 = vmatpush3.bf16.msra.mxu0 %v672_v13  ;;  %1451 = vmatprep.mubr.msk.bf16.mxu0 %vm1578_vm1, %v1577_v2  ;;  %v989_v39 = vrot.slane %v987_v34, 1  ;;  %v1049_v52 = vrot.slane %v930_v28, 1 }
  0x2f   : > { %1461 = vmatprep.subr.bf16.mxu0 %v1577_v2  ;;  %1458 = vmatmul.mubr.msk.bf16.vlgmr.msra.gmra.mxu1 %vm565_vm4, %v735_v9  ;;  %v992_v41 = vshll.u32 %v931_v36, 16  ;;  %v800_v47 = vsel %vm552_vm5, %v795_v42, %v799_v43  ;;  %v1050_v53 = vrot.slane %v931_v36, 1 }
  0x30   : > { %1468 = vmatpush3.bf16.msra.mxu1 %v861_v19  ;;  %1469 = vmatprep.mubr.msk.bf16.mxu1 %vm1578_vm1, %v1577_v2  ;;  %v990_v45 = vor.u32 %v989_v39, %v985_v38 }
  0x31   : > { %1479 = vmatprep.subr.bf16.mxu1 %v1577_v2  ;;  %v994_v46 = vrot.slane %v992_v41, 1  ;;  %v1051_v54 = vsel %vm664_vm6, %v1049_v52, %v1050_v53 }
  0x33   : > { %v995_v49 = vsel %vm552_vm5, %v990_v45, %v994_v46 }
  0x35   : > { %1452 = vmatmul.mubr.msk.bf16.vlgmr.msra.gmra.mxu0 %vm565_vm4, %v667_v29 }
  0x36   : > { %1462 = vmatpush3.bf16.msra.mxu0 %v805_v35  ;;  %1463 = vmatprep.mubr.msk.bf16.mxu0 %vm1578_vm1, %v1577_v2 }
  0x37   : > { %1473 = vmatprep.subr.bf16.mxu0 %v1577_v2  ;;  %1470 = vmatmul.mubr.msk.bf16.vlgmr.msra.gmra.mxu1 %vm565_vm4, %v856_v37 }
  0x38   : > { %1480 = vmatpush3.bf16.msra.mxu1 %v1000_v40  ;;  %1481 = vmatprep.mubr.msk.bf16.mxu1 %vm1578_vm1, %v1577_v2 }
  0x3d   : > { %1464 = vmatmul.mubr.msk.bf16.vlgmr.msra.gmra.mxu0 %vm565_vm4, %v800_v47 }
  0x3e   : > { %1474 = vmatpush3.bf16.msra.mxu0 %v938_v48  ;;  %1475 = vmatprep.mubr.msk.bf16.mxu0 %vm1578_vm1, %v1577_v2 }
  0x3f   : > { %1485 = vmatprep.subr.bf16.mxu0 %v1577_v2  ;;  %1482 = vmatmul.mubr.msk.bf16.vlgmr.msra.gmra.mxu1 %vm565_vm4, %v995_v49 }
  0x45   : > { %1476 = vmatmul.mubr.msk.bf16.vlgmr.msra.gmra.mxu0 %vm565_vm4, %v930_v28 }
  0x46   : > { %1486 = vmatpush3.bf16.msra.mxu0 %v1056_v51  ;;  %1487 = vmatprep.mubr.msk.bf16.mxu0 %vm1578_vm1, %v1577_v2 }
  0x4d   : > { %1488 = vmatmul.mubr.msk.bf16.vlgmr.msra.gmra.mxu0 %vm565_vm4, %v1051_v54 }
  0xe6   : > { %v653_v55 = vpop.f32.mrf.mxu1 }
  0xe8   : > { %v1447_v56 = vpop.f32.mrf.mxu1 }
  0xea   : > { %v656_v57 = vpop.f32.mrf.mxu1 }
  0xec   : > { %v1448_v58 = vpop.f32.mrf.mxu1 }
  0xed   : > { %v607_v59 = vpop.f32.mrf.mxu0 }
  0xee   : > { %v654_v9 = vadd.f32 %v653_v55, %v607_v59 }
  0xef   : > { %v1441_v60 = vpop.f32.mrf.mxu0  ;;  %v779_v61 = vpop.f32.mrf.mxu1 }
  0xf1   : > { %v610_v62 = vpop.f32.mrf.mxu0  ;;  %v1459_v63 = vpop.f32.mrf.mxu1 }
  0xf2   : > { %v657_v8 = vadd.f32 %v656_v57, %v610_v62 }
  0xf3   : > { %v1442_v0 = vpop.f32.mrf.mxu0  ;;  %v782_v1 = vpop.f32.mrf.mxu1 }
  0xf5   : > { %v708_v3 = vpop.f32.mrf.mxu0  ;;  %v1460_v4 = vpop.f32.mrf.mxu1 }
  0xf6   : > { %v715_v12 = vadd.f32 %v708_v3, %v654_v9 }
  0xf7   : > { %v1453_v2 = vpop.f32.mrf.mxu0  ;;  %v897_v5 = vpop.f32.mrf.mxu1 }
  0xf8   : > { %v786_v18 = vadd.f32 %v779_v61, %v715_v12 }
  0xf9   : > { %v711_v6 = vpop.f32.mrf.mxu0  ;;  %v1471_v7 = vpop.f32.mrf.mxu1 }
  0xfa   : > { %v716_v19 = vadd.f32 %v711_v6, %v657_v8 }
  0xfb   : > { %v1454_v10 = vpop.f32.mrf.mxu0  ;;  %v900_v11 = vpop.f32.mrf.mxu1 }
  0xfc   : > { %v787_v25 = vadd.f32 %v782_v1, %v716_v19 }
  0xfd   : > { %v841_v13 = vpop.f32.mrf.mxu0  ;;  %v1472_v15 = vpop.f32.mrf.mxu1 }
  0xfe   : > { %v848_v23 = vadd.f32 %v841_v13, %v786_v18 }
  0xff   : > { %v1465_v16 = vpop.f32.mrf.mxu0  ;;  %v1036_v17 = vpop.f32.mrf.mxu1 }
 0x100   : > { %v904_v28 = vadd.f32 %v897_v5, %v848_v23 }
 0x101   : > { %v844_v20 = vpop.f32.mrf.mxu0  ;;  %v1483_v14 = vpop.f32.mrf.mxu1 }
 0x102   : > { %v849_v29 = vadd.f32 %v844_v20, %v787_v25 }
 0x103   : > { %v1466_v24 = vpop.f32.mrf.mxu0  ;;  %v1039_v21 = vpop.f32.mrf.mxu1 }
 0x104   : > { %v905_v33 = vadd.f32 %v900_v11, %v849_v29 }
 0x105   : > { %v974_v26 = vpop.f32.mrf.mxu0  ;;  %v1484_v27 = vpop.f32.mrf.mxu1 }
 0x106   : > { %v981_v31 = vadd.f32 %v974_v26, %v904_v28 }
 0x107   : > { %v1477_v30 = vpop.f32.mrf.mxu0 }
 0x108   : > { %v1043_v34 = vadd.f32 %v1036_v17, %v981_v31 }
 0x109   : > { %v977_v32 = vpop.f32.mrf.mxu0 }
 0x10a   : > { %v982_v35 = vadd.f32 %v977_v32, %v905_v33 }
 0x10b   : > { %v1478_v22 = vpop.f32.mrf.mxu0 }
 0x10c   : > { %v1044_v39 = vadd.f32 %v1039_v21, %v982_v35 }
 0x10d   : > { %v1092_v36 = vpop.f32.mrf.mxu0 }
 0x10e   : > { %v1099_v37 = vadd.f32 %v1092_v36, %v1043_v34 }
 0x10f   : > { %v1489_v38 = vpop.f32.mrf.mxu0 }
 0x110   : > { %v1405_v40 = vpack.c.bf16 %v1099_v37, %v1099_v37  ;;  %v1123_v42 = vmul.f32 %v1099_v37, %v1099_v37  ;;  %v1112_v45 = vsel %vm565_vm4, %v1099_v37, 0.0 }
 0x111   : > { %v1095_v41 = vpop.f32.mrf.mxu0 }
 0x112   : > { %1110 = vst.msk [vmem:[%s474_s24] sm:$0xf] %vm1109_vm7, %v1405_v40  ;;  %v1100_v43 = vadd.f32 %v1095_v41, %v1044_v39  ;;  %v1125_v50 = vsel %vm565_vm4, %v1123_v42, 0.0 }
 0x113   : > { %v1490_v44 = vpop.f32.mrf.mxu0 }
 0x114   : > { %v1406_v46 = vpack.c.bf16 %v1100_v43, %v1100_v43  ;;  %v1113_v47 = vsel %vm565_vm4, %v1100_v43, 0.0  ;;  %v1124_v48 = vmul.f32 %v1100_v43, %v1100_v43 }
 0x115   : > { %v1114_v49 = vadd.f32 %v1113_v47, %v1112_v45 }
 0x116   : > { %1111 = vst.msk [vmem:[%s474_s24 + $0x4] sm:$0xf] %vm1109_vm7, %v1406_v46  ;;  %v1126_v51 = vsel %vm565_vm4, %v1124_v48, 0.0 }
 0x117   : > { %v1115_v52 = vrot.slane %v1114_v49, 4  ;;  %v1127_v53 = vadd.f32 %v1126_v51, %v1125_v50 }
 0x119   : > { %v1116_v54 = vadd.f32 %v1115_v52, %v1114_v49  ;;  %v1128_v55 = vrot.slane %v1127_v53, 4 }
 0x11b   : > { %v1117_v56 = vrot.slane %v1116_v54, 2  ;;  %v1129_v57 = vadd.f32 %v1128_v55, %v1127_v53 }
 0x11d   : > { %v1118_v58 = vadd.f32 %v1117_v56, %v1116_v54  ;;  %v1130_v59 = vrot.slane %v1129_v57, 2 }
 0x11f   : > { %v1119_v60 = vrot.slane %v1118_v58, 1  ;;  %v1131_v61 = vadd.f32 %v1130_v59, %v1129_v57 }
 0x121   : > { %v1120_v62 = vadd.f32 %v1119_v60, %v1118_v58  ;;  %v1132_v63 = vrot.slane %v1131_v61, 1 }
 0x123   : > { %1122 = vst.msk [vmem:[%s481_s20] sm:$0x1] %vm1121_vm8, %v1120_v62  ;;  %v1133_v0 = vadd.f32 %v1132_v63, %v1131_v61 }
 0x125   : > { %1134 = vst.msk [vmem:[%s488_s15] sm:$0x1] %vm1121_vm8, %v1133_v0 }
 0x126 PF: > { %s19_s9 = sadd.s32 1, %s1575_s9   ;;  %s1860_s27 = smov %s1567_s29 }
 0x127   : > { %p16_p11 = scmp.ge.s32.totalorder %s19_s9, 34   ;;  %s1861_s28 = smov %s1571_s30 }
 0x128   : > { %s1862_s29 = smov %s1865_s10  ;;  %s1863_s30 = smov %s1869_s11 }
 0x129   :  { %18 = sbr.rel (!%p16_p11) target bundleno = 3 (0x3), region = 112 }

</bundles_post_ra>
